<compile_context>
chip_gen: v5e
topology: v5e:2x2
jax: 0.10.0
libtpu: 0.0.40
codegen_flags: <defaults>
</compile_context>

<pallas_src>
import math

import jax
import jax.numpy as jnp
from jax import lax
from jax.experimental import pallas as pl
from jax.experimental.pallas import tpu as pltpu


_INV_SQRT2 = 1.0 / math.sqrt(2.0)


def _mlp_lr_kernel(x_ref, w1_ref, b1_ref, g_ref, beta_ref, avg_ref, w2_ref,
                   b2_ref, o_ref):
    """One row tile of: Linear -> GELU -> LayerNorm -> Dropout(eval) -> Linear.

    Operands are lane-folded: each kernel row holds `fold` logical rows side
    by side, the Linear weights are block-diagonal, and `avg_ref` is a
    block-diagonal (1/hid) averaging matrix so LayerNorm statistics reduce
    over each hid-lane group on the MXU (which is otherwise idle).
    """
    # --- layer 0: (block-diagonal) Linear, f32 accumulation on the MXU ------
    h = jnp.dot(x_ref[...], w1_ref[...], preferred_element_type=jnp.float32)
    h = h + b1_ref[...]

    # --- exact (erf) GELU, matching torch.nn.functional.gelu default --------
    h = 0.5 * h * (1.0 + lax.erf(h * jnp.float32(_INV_SQRT2)))

    # --- LayerNorm(hid) per lane group, eps=1e-5, biased variance -----------
    # Group means via matmul on the idle MXU; bf16 hi/lo split keeps them
    # f32-accurate even though the MXU passes use bf16 inputs.
    avg = avg_ref[...]

    def group_mean(v):
        hi = v.astype(jnp.bfloat16)
        lo = (v - hi.astype(jnp.float32)).astype(jnp.bfloat16)
        return (jnp.dot(hi, avg, preferred_element_type=jnp.float32)
                + jnp.dot(lo, avg, preferred_element_type=jnp.float32))

    mu = group_mean(h)
    var = jnp.maximum(group_mean(h * h) - mu * mu, 0.0)   # single-pass var
    h = (h - mu) * lax.rsqrt(var + jnp.float32(1e-5))
    h = h * g_ref[...] + beta_ref[...]

    # Dropout: the module is evaluated in inference mode -> identity.
    # TODO(synk): training-mode dropout (pltpu.prng_random_bits + 1/(1-p)).

    # --- layer 1: (block-diagonal) Linear -> lane-dense output store --------
    h = h.astype(w2_ref.dtype)
    out = jnp.dot(h, w2_ref[...], preferred_element_type=jnp.float32)
    out = out + b2_ref[...]
    o_ref[...] = out.astype(o_ref.dtype)


def _round_up(v, m):
    return -(-v // m) * m


def _padded_bytes(rows, cols, dtype):
    """VMEM footprint of a (rows, cols) array incl. sublane/lane padding."""
    dt = jnp.dtype(dtype)
    packing = max(1, 4 // dt.itemsize)            # f32 -> 1, bf16 -> 2
    r = _round_up(max(int(rows), 1), 8 * packing)
    c = _round_up(max(int(cols), 1), 128)
    return r * c * dt.itemsize


def _vmem_capacity_bytes():
    try:
        return int(pltpu.get_tpu_info().vmem_capacity_bytes)
    except Exception:
        return 64 << 20          # conservative (v7x per-TensorCore VMEM)


def _largest_block(rows, cap):
    """Largest b <= cap with rows % b == 0 and (b % 8 == 0 or b == rows)."""
    cap = max(1, min(int(cap), int(rows)))
    for b in range(cap, 0, -1):
        if rows % b == 0 and (b % 8 == 0 or b == rows):
            return b
    return rows


def _pick_fold(N, cin, hid, cout):
    """How many logical rows to pack per lane-dense kernel row."""
    for base in (cout, cin):                       # prefer a 128-lane output
        if 0 < base <= 128 and 128 % base == 0:
            f = 128 // base
            if f > 1 and N % f == 0 and f * max(cin, hid, cout) <= 512:
                return f
    return 1


def mlp_lr_forward(x, params, *, target_rows=8192, use_bf16_matmul=True):
    """x: [N, in_channels]; params: see init_params. Returns [N, out_channels]."""
    N, cin = x.shape
    w1, b1, gamma, beta, w2, b2 = (params["w1"], params["b1"], params["gamma"],
                                   params["beta"], params["w2"], params["b2"])
    hid, cout = w1.shape[1], w2.shape[1]
    out_dtype = x.dtype
    mm_dtype = jnp.bfloat16 if use_bf16_matmul else x.dtype

    # ---- lane folding: block-diagonal weights + reshaped inputs ------------
    fold = _pick_fold(N, cin, hid, cout)
    cin_f, hid_f, cout_f = fold * cin, fold * hid, fold * cout
    rows = N // fold

    eye = jnp.eye(fold, dtype=jnp.float32)
    w1_f = jnp.kron(eye, w1).astype(mm_dtype)                    # (cin_f, hid_f)
    w2_f = jnp.kron(eye, w2).astype(mm_dtype)                    # (hid_f, cout_f)
    avg_f = jnp.kron(eye, jnp.full((hid, hid), 1.0 / hid,
                                   dtype=jnp.float32)).astype(jnp.bfloat16)
    b1_f = jnp.tile(b1, (1, fold))
    g_f = jnp.tile(gamma, (1, fold))
    beta_f = jnp.tile(beta, (1, fold))
    b2_f = jnp.tile(b2, (1, fold))
    x_f = x.reshape(rows, cin_f).astype(mm_dtype)                # contiguous view

    # ---- tile sizing: amortise ~0.35us fixed cost per grid step ------------
    capacity = _vmem_capacity_bytes()
    budget = (capacity * 3) // 4                  # headroom below physical VMEM

    weight_bytes = 2 * (_padded_bytes(cin_f, hid_f, mm_dtype)     # (double-
                        + _padded_bytes(hid_f, cout_f, mm_dtype)  #  buffered)
                        + _padded_bytes(hid_f, hid_f, jnp.bfloat16)
                        + 4 * _padded_bytes(1, hid_f, jnp.float32)
                        + _padded_bytes(1, cout_f, jnp.float32))

    def tile_bytes(bm):
        io = 2 * (_padded_bytes(bm, cin_f, mm_dtype)        # double-buffered x
                  + _padded_bytes(bm, cout_f, out_dtype))   # double-buffered out
        tmp = 6 * _padded_bytes(bm, hid_f, jnp.float32)     # f32 intermediates
        return io + tmp + weight_bytes

    target_bm = max(8, _round_up(target_rows, fold) // fold)
    bm = _largest_block(rows, target_bm)
    while tile_bytes(bm) > budget and bm > 8:
        nxt = _largest_block(rows, bm // 2)
        if nxt >= bm:
            break
        bm = nxt
    # Megacore (v7x): keep >= 4 grid steps (2 per TensorCore) when the problem
    # is large enough that each step still amortises its fixed overhead.
    if rows // bm < 4:
        alt = _largest_block(rows, rows // 4)
        if alt >= 128:
            bm = alt

    grid = (rows // bm,)
    vmem_limit = max(min(int(tile_bytes(bm) * 1.5), budget),
                     min(32 << 20, budget))

    cost = pl.CostEstimate(
        flops=2 * rows * (cin_f * hid_f + 4 * hid_f * hid_f + hid_f * cout_f),
        transcendentals=N * hid,
        bytes_accessed=(x_f.size * x_f.dtype.itemsize
                        + w1_f.size * w1_f.dtype.itemsize
                        + w2_f.size * w2_f.dtype.itemsize
                        + avg_f.size * avg_f.dtype.itemsize
                        + 4 * (b1_f.size + g_f.size + beta_f.size + b2_f.size)
                        + rows * cout_f * jnp.dtype(out_dtype).itemsize),
    )

    out = pl.pallas_call(
        _mlp_lr_kernel,
        out_shape=jax.ShapeDtypeStruct((rows, cout_f), out_dtype),
        grid_spec=pltpu.PrefetchScalarGridSpec(
            num_scalar_prefetch=0,
            grid=grid,
            in_specs=[
                pl.BlockSpec((bm, cin_f),     lambda i: (i, 0)),  # x tile
                pl.BlockSpec((cin_f, hid_f),  lambda i: (0, 0)),  # W1 block-diag
                pl.BlockSpec((1, hid_f),      lambda i: (0, 0)),  # b1
                pl.BlockSpec((1, hid_f),      lambda i: (0, 0)),  # LN gamma
                pl.BlockSpec((1, hid_f),      lambda i: (0, 0)),  # LN beta
                pl.BlockSpec((hid_f, hid_f),  lambda i: (0, 0)),  # LN avg matrix
                pl.BlockSpec((hid_f, cout_f), lambda i: (0, 0)),  # W2 block-diag
                pl.BlockSpec((1, cout_f),     lambda i: (0, 0)),  # b2
            ],
            out_specs=pl.BlockSpec((bm, cout_f), lambda i: (i, 0)),
        ),
        compiler_params=pltpu.CompilerParams(
            dimension_semantics=("parallel",),
            vmem_limit_bytes=int(vmem_limit),
        ),
        cost_estimate=cost,
    )(x_f, w1_f, b1_f, g_f, beta_f, avg_f, w2_f, b2_f)

    return out.reshape(N, cout)


def init_params(key, in_channels, out_channels, num_hid):
    """Deterministic synthetic parameter init (matches the module's shapes)."""
    k1, k2, k3, k4 = jax.random.split(key, 4)
    lim1 = 1.0 / math.sqrt(in_channels)
    lim2 = 1.0 / math.sqrt(num_hid)
    return {
        "w1": jax.random.uniform(k1, (in_channels, num_hid), jnp.float32, -lim1, lim1),
        "b1": jax.random.uniform(k2, (1, num_hid), jnp.float32, -lim1, lim1),
        # nn.LayerNorm default init: weight = 1, bias = 0
        "gamma": jnp.ones((1, num_hid), jnp.float32),
        "beta": jnp.zeros((1, num_hid), jnp.float32),
        "w2": jax.random.uniform(k3, (num_hid, out_channels), jnp.float32, -lim2, lim2),
        "b2": jax.random.uniform(k4, (1, out_channels), jnp.float32, -lim2, lim2),
    }


def reference_forward(x, params, *, use_bf16_matmul=True):
    """Pure-JAX reference of the torch module (optionally bf16 matmul inputs)."""
    mm_dtype = jnp.bfloat16 if use_bf16_matmul else x.dtype
    h = jnp.dot(x.astype(mm_dtype), params["w1"].astype(mm_dtype),
                preferred_element_type=jnp.float32) + params["b1"]
    h = jax.nn.gelu(h, approximate=False)
    mu = jnp.mean(h, axis=-1, keepdims=True)
    var = jnp.mean((h - mu) ** 2, axis=-1, keepdims=True)
    h = (h - mu) / jnp.sqrt(var + 1e-5)
    h = h * params["gamma"] + params["beta"]
    return jnp.dot(h.astype(mm_dtype), params["w2"].astype(mm_dtype),
                   preferred_element_type=jnp.float32) + params["b2"]


if __name__ == "__main__":
    key = jax.random.PRNGKey(0)
    kx, kp = jax.random.split(key)

    N, in_channels, num_hid, out_channels = 256, 32, 32, 16
    x = jax.random.normal(kx, (N, in_channels), jnp.float32)
    params = init_params(kp, in_channels, out_channels, num_hid)

    # f32 matmul path: near-exact parity with the pure-f32 reference (slack
    # covers the MXU-based single-pass LayerNorm statistics, ~1e-5 level).
    out_f32 = jax.block_until_ready(
        mlp_lr_forward(x, params, use_bf16_matmul=False))
    ref_f32 = reference_forward(x, params, use_bf16_matmul=False)
    assert out_f32.shape == (N, out_channels)
    assert jnp.allclose(out_f32, ref_f32, atol=1e-3, rtol=1e-3), "f32 mismatch"

    # bf16 matmul path (default, lighter HBM/MXU traffic): vs mirrored ref.
    out_bf16 = jax.block_until_ready(
        mlp_lr_forward(x, params, use_bf16_matmul=True))
    ref_bf16 = reference_forward(x, params, use_bf16_matmul=True)
    assert out_bf16.shape == (N, out_channels)
    assert jnp.allclose(out_bf16, ref_bf16, atol=2e-2, rtol=2e-2), "bf16 mismatch"

    print("KERNEL_OK")
</pallas_src>

<mosaic_0001>
module attributes {stable_mosaic.version = 11 : i64} {
  func.func @_mlp_lr_kernel(%arg0: i32, %arg1: memref<32x256xf32, #tpu.memory_space<vmem>>, %arg2: memref<256x256xf32, #tpu.memory_space<vmem>>, %arg3: memref<1x256xf32, #tpu.memory_space<vmem>>, %arg4: memref<1x256xf32, #tpu.memory_space<vmem>>, %arg5: memref<1x256xf32, #tpu.memory_space<vmem>>, %arg6: memref<256x256xbf16, #tpu.memory_space<vmem>>, %arg7: memref<256x128xf32, #tpu.memory_space<vmem>>, %arg8: memref<1x128xf32, #tpu.memory_space<vmem>>, %arg9: memref<32x128xf32, #tpu.memory_space<vmem>>) attributes {dimension_semantics = [#tpu.dimension_semantics<parallel>], iteration_bounds = array<i64: 1>, scalar_prefetch = 0 : i64, scratch_operands = 0 : i64, tpu.core_type = #tpu.core_type<tc>, window_params = [{transform_indices = @transform_0, window_bounds = array<i64: 32, 256>}, {pipeline_mode = #tpu.pipeline_mode<synchronous>, transform_indices = @transform_1, window_bounds = array<i64: 256, 256>}, {pipeline_mode = #tpu.pipeline_mode<synchronous>, transform_indices = @transform_2, window_bounds = array<i64: 1, 256>}, {pipeline_mode = #tpu.pipeline_mode<synchronous>, transform_indices = @transform_3, window_bounds = array<i64: 1, 256>}, {pipeline_mode = #tpu.pipeline_mode<synchronous>, transform_indices = @transform_4, window_bounds = array<i64: 1, 256>}, {pipeline_mode = #tpu.pipeline_mode<synchronous>, transform_indices = @transform_5, window_bounds = array<i64: 256, 256>}, {pipeline_mode = #tpu.pipeline_mode<synchronous>, transform_indices = @transform_6, window_bounds = array<i64: 256, 128>}, {pipeline_mode = #tpu.pipeline_mode<synchronous>, transform_indices = @transform_7, window_bounds = array<i64: 1, 128>}, {transform_indices = @transform_8, window_bounds = array<i64: 32, 128>}]} {
    %c0 = arith.constant 0 : index
    %c0_0 = arith.constant 0 : index
    %0 = vector.load %arg1[%c0, %c0_0] : memref<32x256xf32, #tpu.memory_space<vmem>>, vector<32x256xf32>
    %c0_1 = arith.constant 0 : index
    %c0_2 = arith.constant 0 : index
    %1 = vector.load %arg2[%c0_1, %c0_2] : memref<256x256xf32, #tpu.memory_space<vmem>>, vector<256x256xf32>
    %cst = arith.constant dense<0.000000e+00> : vector<32x256xf32>
    %2 = tpu.matmul %0, %1, %cst {dimension_numbers = #tpu.dot_dimension_numbers<[1], [0], [0], [1], [0, 0, 1, 1], [], []>} : vector<32x256xf32>, vector<256x256xf32>, vector<32x256xf32> -> vector<32x256xf32>
    %c0_3 = arith.constant 0 : index
    %c0_4 = arith.constant 0 : index
    %3 = vector.load %arg3[%c0_3, %c0_4] : memref<1x256xf32, #tpu.memory_space<vmem>>, vector<1x256xf32>
    %4 = vector.broadcast %3 : vector<1x256xf32> to vector<32x256xf32>
    %5 = arith.addf %2, %4 : vector<32x256xf32>
    %cst_5 = arith.constant 5.000000e-01 : f32
    %6 = vector.broadcast %cst_5 : f32 to vector<32x256xf32>
    %7 = arith.mulf %6, %5 : vector<32x256xf32>
    %cst_6 = arith.constant 0.707106769 : f32
    %8 = vector.broadcast %cst_6 : f32 to vector<32x256xf32>
    %9 = arith.mulf %5, %8 : vector<32x256xf32>
    %10 = math.erf %9 : vector<32x256xf32>
    %cst_7 = arith.constant 1.000000e+00 : f32
    %11 = vector.broadcast %cst_7 : f32 to vector<32x256xf32>
    %12 = arith.addf %11, %10 : vector<32x256xf32>
    %13 = arith.mulf %7, %12 : vector<32x256xf32>
    %c0_8 = arith.constant 0 : index
    %c0_9 = arith.constant 0 : index
    %14 = vector.load %arg6[%c0_8, %c0_9] : memref<256x256xbf16, #tpu.memory_space<vmem>>, vector<256x256xbf16>
    %15 = arith.truncf %13 : vector<32x256xf32> to vector<32x256xbf16>
    %16 = arith.extf %15 : vector<32x256xbf16> to vector<32x256xf32>
    %17 = arith.subf %13, %16 : vector<32x256xf32>
    %18 = arith.truncf %17 : vector<32x256xf32> to vector<32x256xbf16>
    %cst_10 = arith.constant dense<0.000000e+00> : vector<32x256xf32>
    %19 = tpu.matmul %15, %14, %cst_10 {dimension_numbers = #tpu.dot_dimension_numbers<[1], [0], [0], [1], [0, 0, 1, 1], [], []>} : vector<32x256xbf16>, vector<256x256xbf16>, vector<32x256xf32> -> vector<32x256xf32>
    %cst_11 = arith.constant dense<0.000000e+00> : vector<32x256xf32>
    %20 = tpu.matmul %18, %14, %cst_11 {dimension_numbers = #tpu.dot_dimension_numbers<[1], [0], [0], [1], [0, 0, 1, 1], [], []>} : vector<32x256xbf16>, vector<256x256xbf16>, vector<32x256xf32> -> vector<32x256xf32>
    %21 = arith.addf %19, %20 : vector<32x256xf32>
    %22 = arith.mulf %13, %13 : vector<32x256xf32>
    %23 = arith.truncf %22 : vector<32x256xf32> to vector<32x256xbf16>
    %24 = arith.extf %23 : vector<32x256xbf16> to vector<32x256xf32>
    %25 = arith.subf %22, %24 : vector<32x256xf32>
    %26 = arith.truncf %25 : vector<32x256xf32> to vector<32x256xbf16>
    %cst_12 = arith.constant dense<0.000000e+00> : vector<32x256xf32>
    %27 = tpu.matmul %23, %14, %cst_12 {dimension_numbers = #tpu.dot_dimension_numbers<[1], [0], [0], [1], [0, 0, 1, 1], [], []>} : vector<32x256xbf16>, vector<256x256xbf16>, vector<32x256xf32> -> vector<32x256xf32>
    %cst_13 = arith.constant dense<0.000000e+00> : vector<32x256xf32>
    %28 = tpu.matmul %26, %14, %cst_13 {dimension_numbers = #tpu.dot_dimension_numbers<[1], [0], [0], [1], [0, 0, 1, 1], [], []>} : vector<32x256xbf16>, vector<256x256xbf16>, vector<32x256xf32> -> vector<32x256xf32>
    %29 = arith.addf %27, %28 : vector<32x256xf32>
    %30 = arith.mulf %21, %21 : vector<32x256xf32>
    %31 = arith.subf %29, %30 : vector<32x256xf32>
    %cst_14 = arith.constant 0.000000e+00 : f32
    %32 = vector.broadcast %cst_14 : f32 to vector<32x256xf32>
    %33 = arith.maximumf %31, %32 : vector<32x256xf32>
    %34 = arith.subf %13, %21 : vector<32x256xf32>
    %cst_15 = arith.constant 9.99999974E-6 : f32
    %35 = vector.broadcast %cst_15 : f32 to vector<32x256xf32>
    %36 = arith.addf %33, %35 : vector<32x256xf32>
    %37 = math.rsqrt %36 : vector<32x256xf32>
    %38 = arith.mulf %34, %37 : vector<32x256xf32>
    %c0_16 = arith.constant 0 : index
    %c0_17 = arith.constant 0 : index
    %39 = vector.load %arg4[%c0_16, %c0_17] : memref<1x256xf32, #tpu.memory_space<vmem>>, vector<1x256xf32>
    %40 = vector.broadcast %39 : vector<1x256xf32> to vector<32x256xf32>
    %41 = arith.mulf %38, %40 : vector<32x256xf32>
    %c0_18 = arith.constant 0 : index
    %c0_19 = arith.constant 0 : index
    %42 = vector.load %arg5[%c0_18, %c0_19] : memref<1x256xf32, #tpu.memory_space<vmem>>, vector<1x256xf32>
    %43 = vector.broadcast %42 : vector<1x256xf32> to vector<32x256xf32>
    %44 = arith.addf %41, %43 : vector<32x256xf32>
    %c0_20 = arith.constant 0 : index
    %c0_21 = arith.constant 0 : index
    %45 = vector.load %arg7[%c0_20, %c0_21] : memref<256x128xf32, #tpu.memory_space<vmem>>, vector<256x128xf32>
    %cst_22 = arith.constant dense<0.000000e+00> : vector<32x128xf32>
    %46 = tpu.matmul %44, %45, %cst_22 {dimension_numbers = #tpu.dot_dimension_numbers<[1], [0], [0], [1], [0, 0, 1, 1], [], []>} : vector<32x256xf32>, vector<256x128xf32>, vector<32x128xf32> -> vector<32x128xf32>
    %c0_23 = arith.constant 0 : index
    %c0_24 = arith.constant 0 : index
    %47 = vector.load %arg8[%c0_23, %c0_24] : memref<1x128xf32, #tpu.memory_space<vmem>>, vector<1x128xf32>
    %48 = vector.broadcast %47 : vector<1x128xf32> to vector<32x128xf32>
    %49 = arith.addf %46, %48 : vector<32x128xf32>
    %c0_25 = arith.constant 0 : index
    %c0_26 = arith.constant 0 : index
    %50 = vector.load %arg9[%c0_25, %c0_26] : memref<32x128xf32, #tpu.memory_space<vmem>>, vector<32x128xf32>
    tpu.vector_store %arg9[%c0_25, %c0_26], %49 {strides = array<i32>} : memref<32x128xf32, #tpu.memory_space<vmem>>, vector<32x128xf32>,
    return
  }
  func.func @transform_0(%arg0: i32) -> (i32, i32) {
    %c0_i32 = arith.constant 0 : i32
    %c0_i32_0 = arith.constant 0 : i32
    return %arg0, %c0_i32 : i32, i32
  }
  func.func @transform_1(%arg0: i32) -> (i32, i32) {
    %c0_i32 = arith.constant 0 : i32
    %c0_i32_0 = arith.constant 0 : i32
    %c0_i32_1 = arith.constant 0 : i32
    return %c0_i32, %c0_i32_0 : i32, i32
  }
  func.func @transform_2(%arg0: i32) -> (i32, i32) {
    %c0_i32 = arith.constant 0 : i32
    %c0_i32_0 = arith.constant 0 : i32
    %c0_i32_1 = arith.constant 0 : i32
    return %c0_i32, %c0_i32_0 : i32, i32
  }
  func.func @transform_3(%arg0: i32) -> (i32, i32) {
    %c0_i32 = arith.constant 0 : i32
    %c0_i32_0 = arith.constant 0 : i32
    %c0_i32_1 = arith.constant 0 : i32
    return %c0_i32, %c0_i32_0 : i32, i32
  }
  func.func @transform_4(%arg0: i32) -> (i32, i32) {
    %c0_i32 = arith.constant 0 : i32
    %c0_i32_0 = arith.constant 0 : i32
    %c0_i32_1 = arith.constant 0 : i32
    return %c0_i32, %c0_i32_0 : i32, i32
  }
  func.func @transform_5(%arg0: i32) -> (i32, i32) {
    %c0_i32 = arith.constant 0 : i32
    %c0_i32_0 = arith.constant 0 : i32
    %c0_i32_1 = arith.constant 0 : i32
    return %c0_i32, %c0_i32_0 : i32, i32
  }
  func.func @transform_6(%arg0: i32) -> (i32, i32) {
    %c0_i32 = arith.constant 0 : i32
    %c0_i32_0 = arith.constant 0 : i32
    %c0_i32_1 = arith.constant 0 : i32
    return %c0_i32, %c0_i32_0 : i32, i32
  }
  func.func @transform_7(%arg0: i32) -> (i32, i32) {
    %c0_i32 = arith.constant 0 : i32
    %c0_i32_0 = arith.constant 0 : i32
    %c0_i32_1 = arith.constant 0 : i32
    return %c0_i32, %c0_i32_0 : i32, i32
  }
  func.func @transform_8(%arg0: i32) -> (i32, i32) {
    %c0_i32 = arith.constant 0 : i32
    %c0_i32_0 = arith.constant 0 : i32
    return %arg0, %c0_i32 : i32, i32
  }
}

</mosaic_0001>

<bundles_post_ra>
// kernel: tpu_custom_call.1
= control target key start
LH: loop header
LB: loop body
LE: loop exit
PB: predicated region body
PF: predicated region fallthrough
CT: control target
= control target key end

     0   :  { %13 = vsyncpa [#allocation3], 0  ;;  %s2968_s0 = inlined_call_operand.hbm [shape: f32[32,256], index: 0, kind: input, shape index: {}]   ;;  %s2969_s1 = inlined_call_operand.hbm [shape: f32[256,256], index: 1, kind: input, shape index: {}]   ;;  %s2970_s2 = inlined_call_operand.hbm [shape: f32[1,256], index: 2, kind: input, shape index: {}]   ;;  %s2971_s3 = inlined_call_operand.vmem [shape: f32[1,256], index: 3, kind: input, shape index: {}]   ;;  %s2972_s4 = inlined_call_operand.hbm [shape: f32[1,256], index: 4, kind: input, shape index: {}]   ;;  %s2973_s5 = inlined_call_operand.hbm [shape: bf16[256,256], index: 5, kind: input, shape index: {}]   ;;  %s2974_s6 = inlined_call_operand.hbm [shape: f32[256,128], index: 6, kind: input, shape index: {}]   ;;  %s2975_s7 = inlined_call_operand.vmem [shape: f32[1,128], index: 7, kind: input, shape index: {}]   ;;  %s2976_s8 = inlined_call_operand.hbm [shape: f32[32,128], index: 8, kind: output, shape index: {}]  }
   0x1   :  { %14 = vsyncpa [#allocation6], 0 }
   0x2   :  { %15 = vsyncpa [#allocation9], 0 }
   0x3   :  { %16 = vsyncpa [#allocation12], 0 }
   0x4   :  { %17 = vsyncpa [#allocation4], 0  ;;  %s35_s29 = sshll.u32 %s2969_s1, 4  ;;  %s1956_s30 = smov [#allocation5]   ;;  %s36_s29 = int_to_ptr.hbm [resolvable:$true] %s35_s29 }
   0x5   :  { %s37_s9 = sshll.u32 %s1956_s30, 4  ;;  %s62_s12 = sshll.u32 %s2972_s4, 4  ;;  %s38_s9 = int_to_ptr.vmem [resolvable:$true] %s37_s9  ;;  %s63_s12 = int_to_ptr.hbm [resolvable:$true] %s62_s12 }
   0x6   :  { %s1957_s13 = smov 256   ;;  %s1958_s14 = smov 16  }
   0x7   :  { %43 = dma.hbm_to_vmem [thread:$0]  %s36_s29, 8192, %s38_s9, [#allocation6], %s1957_s13, %s1957_s13, %s1958_s14  }
   0x8   :  { %s1959_s15 = smov [#allocation8]   ;;  %s22_s19 = sshll.u32 %s2968_s0, 4  ;;  %s23_s19 = int_to_ptr.hbm [resolvable:$true] %s22_s19 }
   0x9   :  { %s64_s16 = sshll.u32 %s1959_s15, 4  ;;  %s49_s21 = sshll.u32 %s2970_s2, 4  ;;  %s65_s16 = int_to_ptr.vmem [resolvable:$true] %s64_s16  ;;  %s50_s21 = int_to_ptr.hbm [resolvable:$true] %s49_s21 }
   0xa   :  { %67 = dma.hbm_to_vmem [thread:$0]  %s63_s12, 32, %s65_s16, [#allocation9]  }
   0xb   :  { %s1960_s22 = smov [#allocation2]   ;;  %s1961_s4 = smov [#allocation7]  }
   0xc   :  { %s24_s23 = sshll.u32 %s1960_s22, 4  ;;  %s51_s24 = sshll.u32 %s1961_s4, 4  ;;  %s25_s23 = int_to_ptr.vmem [resolvable:$true] %s24_s23  ;;  %s52_s24 = int_to_ptr.vmem [resolvable:$true] %s51_s24 }
   0xd   :  { %30 = dma.hbm_to_vmem [thread:$0]  %s23_s19, 1024, %s25_s23, [#allocation3], %s1957_s13, %s1957_s13, %s1958_s14  }
   0xe   :  { %s72_s27 = sshll.u32 %s2973_s5, 4  ;;  %s1962_s0 = smov [#allocation10]   ;;  %s73_s27 = int_to_ptr.hbm [resolvable:$true] %s72_s27 }
   0xf   :  { %54 = dma.hbm_to_vmem [thread:$0]  %s50_s21, 32, %s52_s24, [#allocation6]  }
  0x10   :  { %s74_s28 = sshll.u32 %s1962_s0, 4  ;;  %s85_s2 = sshll.u32 %s2974_s6, 4  ;;  %s75_s28 = int_to_ptr.vmem [resolvable:$true] %s74_s28  ;;  %s86_s2 = int_to_ptr.hbm [resolvable:$true] %s85_s2 }
  0x11   :  { %s1963_s9 = smov 128   ;;  %s1964_s10 = smov 8  }
  0x12   :  { %80 = dma.hbm_to_vmem [thread:$0]  %s73_s27, 4096, %s75_s28, [#allocation9], %s1963_s9, %s1963_s9, %s1964_s10  }
  0x13   :  { %s1965_s11 = smov [#allocation11]  }
  0x14   :  { %s87_s12 = sshll.u32 %s1965_s11, 4  ;;  %s88_s12 = int_to_ptr.vmem [resolvable:$true] %s87_s12 }
  0x15   :  { %93 = dma.hbm_to_vmem [thread:$0]  %s86_s2, 4096, %s88_s12, [#allocation12], %s1963_s9, %s1963_s9, %s1964_s10  }
  0x16   :  { %1946 = dma.done.wait [#allocation3], 1024  }
  0x17   :  { %1947 = vsyncadd [#allocation3], 4294966272 }
  0x18   :  { %1948 = dma.done.wait [#allocation6], 8224  }
  0x19   :  { %1949 = vsyncadd [#allocation6], 4294959072 }
  0x1a   :  { %1950 = dma.done.wait [#allocation9], 4128  }
  0x1b   :  { %1951 = vsyncadd [#allocation9], 4294963168 }
  0x1c   :  { %1952 = dma.done.wait [#allocation12], 4096  }
  0x1d   :  { %1953 = vsyncadd [#allocation12], 4294963200  ;;  %v158_v0 = vld [vmem:[#allocation5 + $0xf0] sm:$0xff]  ;;  %v159_v1 = vld [vmem:[#allocation5 + $0xf8] sm:$0xff]  ;;  %s1966_s14 = smov [#allocation13]   ;;  %s1518_s17 = sshll.u32 %s2976_s8, 4  ;;  %s1519_s17 = int_to_ptr.hbm [resolvable:$true] %s1518_s17 }
  0x1e   :  { %v156_v2 = vld [vmem:[#allocation5 + $0xe0] sm:$0xff]  ;;  %198 = vmatpush.msra.mxu0 %v158_v0  ;;  %256 = vmatpush.msra.mxu2 %v159_v1  ;;  %v190_v3 = vld [vmem:[#allocation5 + $0x1f0] sm:$0xff]  ;;  %v157_v4 = vld [vmem:[#allocation5 + $0xe8] sm:$0xff]  ;;  %s1516_s15 = sshll.u32 %s1966_s14, 4  ;;  %s1517_s15 = int_to_ptr.vmem [resolvable:$true] %s1516_s15 }
  0x1f   :  { %v191_v5 = vld [vmem:[#allocation5 + $0x1f8] sm:$0xff]  ;;  %227 = vmatpush.msra.mxu1 %v190_v3  ;;  %v154_v6 = vld [vmem:[#allocation5 + $0xd0] sm:$0xff]  ;;  %v188_v7 = vld [vmem:[#allocation5 + $0x1e0] sm:$0xff] }
  0x20   :  { %285 = vmatpush.msra.mxu3 %v191_v5  ;;  %v155_v8 = vld [vmem:[#allocation5 + $0xd8] sm:$0xff]  ;;  %199 = vmatpush.msra.mxu0 %v156_v2  ;;  %v189_v9 = vld [vmem:[#allocation5 + $0x1e8] sm:$0xff]  ;;  %v186_v10 = vld [vmem:[#allocation5 + $0x1d0] sm:$0xff] }
  0x21   :  { %257 = vmatpush.msra.mxu2 %v157_v4  ;;  %228 = vmatpush.msra.mxu1 %v188_v7  ;;  %v152_v11 = vld [vmem:[#allocation5 + $0xc0] sm:$0xff]  ;;  %v153_v12 = vld [vmem:[#allocation5 + $0xc8] sm:$0xff]  ;;  %v187_v13 = vld [vmem:[#allocation5 + $0x1d8] sm:$0xff] }
  0x22   :  { %286 = vmatpush.msra.mxu3 %v189_v9  ;;  %200 = vmatpush.msra.mxu0 %v154_v6  ;;  %v184_v14 = vld [vmem:[#allocation5 + $0x1c0] sm:$0xff]  ;;  %v185_v15 = vld [vmem:[#allocation5 + $0x1c8] sm:$0xff]  ;;  %v150_v16 = vld [vmem:[#allocation5 + $0xb0] sm:$0xff] }
  0x23   :  { %258 = vmatpush.msra.mxu2 %v155_v8  ;;  %229 = vmatpush.msra.mxu1 %v186_v10  ;;  %v151_v17 = vld [vmem:[#allocation5 + $0xb8] sm:$0xff]  ;;  %v182_v18 = vld [vmem:[#allocation5 + $0x1b0] sm:$0xff]  ;;  %v148_v20 = vld [vmem:[#allocation5 + $0xa0] sm:$0xff] }
  0x24   :  { %287 = vmatpush.msra.mxu3 %v187_v13  ;;  %201 = vmatpush.msra.mxu0 %v152_v11  ;;  %v183_v19 = vld [vmem:[#allocation5 + $0x1b8] sm:$0xff]  ;;  %v149_v21 = vld [vmem:[#allocation5 + $0xa8] sm:$0xff]  ;;  %v180_v22 = vld [vmem:[#allocation5 + $0x1a0] sm:$0xff] }
  0x25   :  { %259 = vmatpush.msra.mxu2 %v153_v12  ;;  %230 = vmatpush.msra.mxu1 %v184_v14  ;;  %v181_v23 = vld [vmem:[#allocation5 + $0x1a8] sm:$0xff]  ;;  %v146_v24 = vld [vmem:[#allocation5 + $0x90] sm:$0xff]  ;;  %v147_v25 = vld [vmem:[#allocation5 + $0x98] sm:$0xff] }
  0x26   :  { %288 = vmatpush.msra.mxu3 %v185_v15  ;;  %202 = vmatpush.msra.mxu0 %v150_v16  ;;  %v178_v26 = vld [vmem:[#allocation5 + $0x190] sm:$0xff]  ;;  %v179_v27 = vld [vmem:[#allocation5 + $0x198] sm:$0xff]  ;;  %v144_v28 = vld [vmem:[#allocation5 + $0x80] sm:$0xff] }
  0x27   :  { %260 = vmatpush.msra.mxu2 %v151_v17  ;;  %231 = vmatpush.msra.mxu1 %v182_v18  ;;  %v145_v29 = vld [vmem:[#allocation5 + $0x88] sm:$0xff]  ;;  %v176_v30 = vld [vmem:[#allocation5 + $0x180] sm:$0xff]  ;;  %v142_v32 = vld [vmem:[#allocation5 + $0x70] sm:$0xff] }
  0x28   :  { %289 = vmatpush.msra.mxu3 %v183_v19  ;;  %203 = vmatpush.msra.mxu0 %v148_v20  ;;  %v177_v31 = vld [vmem:[#allocation5 + $0x188] sm:$0xff]  ;;  %v143_v33 = vld [vmem:[#allocation5 + $0x78] sm:$0xff]  ;;  %v174_v34 = vld [vmem:[#allocation5 + $0x170] sm:$0xff] }
  0x29   :  { %261 = vmatpush.msra.mxu2 %v149_v21  ;;  %232 = vmatpush.msra.mxu1 %v180_v22  ;;  %v175_v35 = vld [vmem:[#allocation5 + $0x178] sm:$0xff]  ;;  %v140_v36 = vld [vmem:[#allocation5 + $0x60] sm:$0xff]  ;;  %v141_v37 = vld [vmem:[#allocation5 + $0x68] sm:$0xff] }
  0x2a   :  { %290 = vmatpush.msra.mxu3 %v181_v23  ;;  %204 = vmatpush.msra.mxu0 %v146_v24  ;;  %v172_v38 = vld [vmem:[#allocation5 + $0x160] sm:$0xff]  ;;  %v173_v39 = vld [vmem:[#allocation5 + $0x168] sm:$0xff]  ;;  %v138_v40 = vld [vmem:[#allocation5 + $0x50] sm:$0xff] }
  0x2b   :  { %262 = vmatpush.msra.mxu2 %v147_v25  ;;  %233 = vmatpush.msra.mxu1 %v178_v26  ;;  %v139_v41 = vld [vmem:[#allocation5 + $0x58] sm:$0xff]  ;;  %v170_v42 = vld [vmem:[#allocation5 + $0x150] sm:$0xff]  ;;  %v136_v44 = vld [vmem:[#allocation5 + $0x40] sm:$0xff] }
  0x2c   :  { %291 = vmatpush.msra.mxu3 %v179_v27  ;;  %205 = vmatpush.msra.mxu0 %v144_v28  ;;  %v171_v43 = vld [vmem:[#allocation5 + $0x158] sm:$0xff]  ;;  %v137_v45 = vld [vmem:[#allocation5 + $0x48] sm:$0xff]  ;;  %v168_v46 = vld [vmem:[#allocation5 + $0x140] sm:$0xff] }
  0x2d   :  { %263 = vmatpush.msra.mxu2 %v145_v29  ;;  %234 = vmatpush.msra.mxu1 %v176_v30  ;;  %v169_v47 = vld [vmem:[#allocation5 + $0x148] sm:$0xff]  ;;  %v134_v48 = vld [vmem:[#allocation5 + $0x30] sm:$0xff]  ;;  %v135_v49 = vld [vmem:[#allocation5 + $0x38] sm:$0xff] }
  0x2e   :  { %292 = vmatpush.msra.mxu3 %v177_v31  ;;  %206 = vmatpush.msra.mxu0 %v142_v32  ;;  %v166_v50 = vld [vmem:[#allocation5 + $0x130] sm:$0xff]  ;;  %v167_v51 = vld [vmem:[#allocation5 + $0x138] sm:$0xff]  ;;  %v132_v52 = vld [vmem:[#allocation5 + $0x20] sm:$0xff] }
  0x2f   :  { %264 = vmatpush.msra.mxu2 %v143_v33  ;;  %235 = vmatpush.msra.mxu1 %v174_v34  ;;  %v133_v53 = vld [vmem:[#allocation5 + $0x28] sm:$0xff]  ;;  %v164_v54 = vld [vmem:[#allocation5 + $0x120] sm:$0xff]  ;;  %v130_v56 = vld [vmem:[#allocation5 + $0x10] sm:$0xff] }
  0x30   :  { %293 = vmatpush.msra.mxu3 %v175_v35  ;;  %207 = vmatpush.msra.mxu0 %v140_v36  ;;  %v165_v55 = vld [vmem:[#allocation5 + $0x128] sm:$0xff]  ;;  %v131_v57 = vld [vmem:[#allocation5 + $0x18] sm:$0xff]  ;;  %v162_v58 = vld [vmem:[#allocation5 + $0x110] sm:$0xff] }
  0x31   :  { %265 = vmatpush.msra.mxu2 %v141_v37  ;;  %236 = vmatpush.msra.mxu1 %v172_v38  ;;  %v163_v59 = vld [vmem:[#allocation5 + $0x118] sm:$0xff]  ;;  %v128_v60 = vld [vmem:[#allocation5] sm:$0xff]  ;;  %v129_v61 = vld [vmem:[#allocation5 + $0x8] sm:$0xff] }
  0x32   :  { %294 = vmatpush.msra.mxu3 %v173_v39  ;;  %208 = vmatpush.msra.mxu0 %v138_v40  ;;  %v120_v62 = vld [vmem:[#allocation2] sm:$0xff]  ;;  %v161_v0 = vld [vmem:[#allocation5 + $0x108] sm:$0xff]  ;;  %v122_v2 = vld [vmem:[#allocation2 + $0x10] sm:$0xff] }
  0x33   :  { %266 = vmatpush.msra.mxu2 %v139_v41  ;;  %237 = vmatpush.msra.mxu1 %v170_v42  ;;  %v160_v63 = vld [vmem:[#allocation5 + $0x100] sm:$0xff]  ;;  %v121_v1 = vld [vmem:[#allocation2 + $0x8] sm:$0xff]  ;;  %v123_v3 = vld [vmem:[#allocation2 + $0x18] sm:$0xff] }
  0x34   :  { %295 = vmatpush.msra.mxu3 %v171_v43  ;;  %209 = vmatpush.msra.mxu0 %v136_v44  ;;  %v124_v4 = vld [vmem:[#allocation2 + $0x20] sm:$0xff]  ;;  %v125_v5 = vld [vmem:[#allocation2 + $0x28] sm:$0xff]  ;;  %v126_v6 = vld [vmem:[#allocation2 + $0x30] sm:$0xff] }
  0x35   :  { %267 = vmatpush.msra.mxu2 %v137_v45  ;;  %238 = vmatpush.msra.mxu1 %v168_v46  ;;  %v127_v7 = vld [vmem:[#allocation2 + $0x38] sm:$0xff]  ;;  %v192_v8 = vld [vmem:[#allocation7] sm:$0x3] }
  0x36   :  { %296 = vmatpush.msra.mxu3 %v169_v47  ;;  %210 = vmatpush.msra.mxu0 %v134_v48  ;;  %v2036_v9 = vperm.slane %v192_v8, 0  ;;  %v2041_v14 = vperm.slane %v192_v8, 1 }
  0x37   :  { %268 = vmatpush.msra.mxu2 %v135_v49  ;;  %239 = vmatpush.msra.mxu1 %v166_v50 }
  0x38   :  { %297 = vmatpush.msra.mxu3 %v167_v51  ;;  %211 = vmatpush.msra.mxu0 %v132_v52 }
  0x39   :  { %269 = vmatpush.msra.mxu2 %v133_v53  ;;  %240 = vmatpush.msra.mxu1 %v164_v54 }
  0x3a   :  { %298 = vmatpush.msra.mxu3 %v165_v55  ;;  %212 = vmatpush.msra.mxu0 %v130_v56 }
  0x3b   :  { %270 = vmatpush.msra.mxu2 %v131_v57  ;;  %241 = vmatpush.msra.mxu1 %v162_v58 }
  0x3c   :  { %299 = vmatpush.msra.mxu3 %v163_v59  ;;  %213 = vmatpush.msra.mxu0 %v128_v60 }
  0x3d   :  { %271 = vmatpush.msra.mxu2 %v129_v61  ;;  %214 = vmatmul.f32.vlgmr.msra.gmra.mxu0 %v120_v62 }
  0x3e   :  { %272 = vmatmul.f32.vlgmr.msra.gmra.mxu2 %v120_v62  ;;  %242 = vmatpush.msra.mxu1 %v160_v63 }
  0x3f   :  { %300 = vmatpush.msra.mxu3 %v161_v0  ;;  %243 = vmatmul.f32.vlgmr.msra.gmra.mxu1 %v121_v1 }
  0x40   :  { %301 = vmatmul.f32.vlgmr.msra.gmra.mxu3 %v121_v1 }
  0x45   :  { %217 = vmatmul.f32.gmra.mxu0 %v122_v2 }
  0x46   :  { %275 = vmatmul.f32.gmra.mxu2 %v122_v2 }
  0x47   :  { %246 = vmatmul.f32.gmra.mxu1 %v123_v3 }
  0x48   :  { %304 = vmatmul.f32.gmra.mxu3 %v123_v3 }
  0x4d   :  { %220 = vmatmul.f32.gmra.mxu0 %v124_v4 }
  0x4e   :  { %278 = vmatmul.f32.gmra.mxu2 %v124_v4 }
  0x4f   :  { %249 = vmatmul.f32.gmra.mxu1 %v125_v5 }
  0x50   :  { %307 = vmatmul.f32.gmra.mxu3 %v125_v5 }
  0x55   :  { %223 = vmatmul.f32.gmra.mxu0 %v126_v6 }
  0x56   :  { %281 = vmatmul.f32.gmra.mxu2 %v126_v6 }
  0x57   :  { %252 = vmatmul.f32.gmra.mxu1 %v127_v7 }
  0x58   :  { %310 = vmatmul.f32.gmra.mxu3 %v127_v7 }
  0xba   :  { %v215_v10 = vpop.f32.mrf.mxu0 }
  0xbb   :  { %v216_v11 = vadd.f32 %v215_v10, %v2036_v9 }
  0xbc   :  { %v244_v12 = vpop.f32.mrf.mxu1 }
  0xbd   :  { %v2039_v13 = vadd.f32 %v244_v12, %v216_v11 }
  0xbf   :  { %v2044_v15 = vmul.f32 0.70710677, %v2039_v13 }
  0xc1   :  { %v273_v16 = vpop.f32.mrf.mxu2  ;;  %v330_v17 = vmul.f32 %v2044_v15, %v2044_v15 }
  0xc2   :  { %v274_v18 = vadd.f32 %v273_v16, %v2041_v14  ;;  %v218_v19 = vpop.f32.mrf.mxu0 }
  0xc3   :  { %v302_v20 = vpop.f32.mrf.mxu3  ;;  %v2049_v21 = vmin.f32 %v330_v17, 16.0  ;;  %v219_v22 = vadd.f32 %v218_v19, %v2036_v9 }
  0xc4   :  { %v2052_v23 = vadd.f32 %v302_v20, %v274_v18  ;;  %v247_v24 = vpop.f32.mrf.mxu1 }
  0xc5   :  { %v332_v25 = vmul.f32 2.1237322e-06, %v2049_v21  ;;  %v343_v26 = vmul.f32 3.8918573e-05, %v2049_v21  ;;  %v2056_v27 = vadd.f32 %v247_v24, %v219_v22 }
  0xc6   :  { %v2059_v28 = vmul.f32 0.70710677, %v2052_v23 }
  0xc7   :  { %v333_v29 = vadd.f32 0.00028619796, %v332_v25  ;;  %v344_v30 = vadd.f32 0.001143296, %v343_v26  ;;  %v2064_v32 = vmul.f32 0.70710677, %v2056_v27 }
  0xc8   :  { %v370_v31 = vmul.f32 %v2059_v28, %v2059_v28 }
  0xc9   :  { %v276_v33 = vpop.f32.mrf.mxu2  ;;  %v334_v34 = vmul.f32 %v333_v29, %v2049_v21  ;;  %v345_v35 = vmul.f32 %v344_v30, %v2049_v21  ;;  %v410_v38 = vmul.f32 %v2064_v32, %v2064_v32 }
  0xca   :  { %v277_v36 = vadd.f32 %v276_v33, %v2041_v14  ;;  %v2069_v37 = vmin.f32 %v370_v31, 16.0  ;;  %v221_v46 = vpop.f32.mrf.mxu0 }
  0xcb   :  { %v305_v39 = vpop.f32.mrf.mxu3  ;;  %v335_v40 = vadd.f32 0.0036580483, %v334_v34  ;;  %v346_v41 = vadd.f32 0.014752088, %v345_v35  ;;  %v2077_v45 = vmin.f32 %v410_v38, 16.0  ;;  %v222_v54 = vadd.f32 %v221_v46, %v2036_v9 }
  0xcc   :  { %v2073_v42 = vadd.f32 %v305_v39, %v277_v36  ;;  %v372_v43 = vmul.f32 2.1237322e-06, %v2069_v37  ;;  %v383_v44 = vmul.f32 3.8918573e-05, %v2069_v37  ;;  %v250_v60 = vpop.f32.mrf.mxu1 }
  0xcd   :  { %v347_v47 = vmul.f32 %v346_v41, %v2049_v21  ;;  %v412_v51 = vmul.f32 2.1237322e-06, %v2077_v45  ;;  %v423_v53 = vmul.f32 3.8918573e-05, %v2077_v45  ;;  %v336_v56 = vmul.f32 %v335_v40, %v2049_v21 }
  0xce   :  { %v2081_v48 = vmul.f32 0.70710677, %v2073_v42  ;;  %v373_v49 = vadd.f32 0.00028619796, %v372_v43  ;;  %v384_v50 = vadd.f32 0.001143296, %v383_v44  ;;  %v2097_v6 = vadd.f32 %v250_v60, %v222_v54 }
  0xcf   :  { %v348_v52 = vadd.f32 0.112945676, %v347_v47  ;;  %v413_v59 = vadd.f32 0.00028619796, %v412_v51  ;;  %v424_v62 = vadd.f32 0.001143296, %v423_v53 }
  0xd0   :  { %v450_v55 = vmul.f32 %v2081_v48, %v2081_v48  ;;  %v374_v57 = vmul.f32 %v373_v49, %v2069_v37  ;;  %v385_v58 = vmul.f32 %v384_v50, %v2069_v37  ;;  %v337_v7 = vadd.f32 0.05243302, %v336_v56 }
  0xd1   :  { %v349_v61 = vmul.f32 %v348_v52, %v2049_v21  ;;  %v414_v2 = vmul.f32 %v413_v59, %v2077_v45  ;;  %v425_v4 = vmul.f32 %v424_v62, %v2077_v45  ;;  %v2108_v26 = vmul.f32 0.70710677, %v2097_v6  ;;  %v279_v59 = vpop.f32.mrf.mxu2 }
  0xd2   :  { %v2092_v63 = vmin.f32 %v450_v55, 16.0  ;;  %v375_v0 = vadd.f32 0.0036580483, %v374_v57  ;;  %v386_v1 = vadd.f32 0.014752088, %v385_v58  ;;  %v338_v29 = vmul.f32 %v337_v7, %v2049_v21 }
  0xd3   :  { %v350_v3 = vadd.f32 0.4994258, %v349_v61  ;;  %v415_v10 = vadd.f32 0.0036580483, %v414_v2  ;;  %v426_v17 = vadd.f32 0.014752088, %v425_v4  ;;  %v490_v39 = vmul.f32 %v2108_v26, %v2108_v26 }
  0xd4   :  { %v452_v5 = vmul.f32 2.1237322e-06, %v2092_v63  ;;  %v387_v8 = vmul.f32 %v386_v1, %v2069_v37  ;;  %v463_v11 = vmul.f32 3.8918573e-05, %v2092_v63  ;;  %v376_v16 = vmul.f32 %v375_v0, %v2069_v37 }
  0xd5   :  { %v351_v12 = vmul.f32 %v350_v3, %v2049_v21  ;;  %v427_v24 = vmul.f32 %v426_v17, %v2077_v45  ;;  %v416_v31 = vmul.f32 %v415_v10, %v2077_v45  ;;  %v339_v40 = vadd.f32 0.18741608, %v338_v29 }
  0xd6   :  { %v453_v18 = vadd.f32 0.00028619796, %v452_v5  ;;  %v388_v19 = vadd.f32 0.112945676, %v387_v8  ;;  %v464_v20 = vadd.f32 0.001143296, %v463_v11  ;;  %v280_v3 = vadd.f32 %v279_v59, %v2041_v14  ;;  %v308_v8 = vpop.f32.mrf.mxu3 }
  0xd7   :  { %v2103_v22 = vadd.f32 1.0, %v351_v12  ;;  %v377_v33 = vadd.f32 0.05243302, %v376_v16  ;;  %v428_v36 = vadd.f32 0.112945676, %v427_v24  ;;  %v2120_v49 = vmin.f32 %v490_v39, 16.0 }
  0xd8   :  { %v454_v25 = vmul.f32 %v453_v18, %v2092_v63  ;;  %v389_v30 = vmul.f32 %v388_v19, %v2069_v37  ;;  %v465_v34 = vmul.f32 %v464_v20, %v2092_v63  ;;  %v417_v43 = vadd.f32 0.05243302, %v416_v31 }
  0xd9   :  { %1746 = vrcp.f32 %v2103_v22  ;;  %v378_v44 = vmul.f32 %v377_v33, %v2069_v37  ;;  %v429_v46 = vmul.f32 %v428_v36, %v2077_v45  ;;  %v492_v55 = vmul.f32 2.1237322e-06, %v2120_v49 }
  0xda   :  { %v390_v35 = vadd.f32 0.4994258, %v389_v30  ;;  %v455_v38 = vadd.f32 0.0036580483, %v454_v25  ;;  %v466_v47 = vadd.f32 0.014752088, %v465_v34  ;;  %v340_v56 = vmul.f32 %v339_v40, %v2049_v21 }
  0xdb   :  { %v430_v53 = vadd.f32 0.4994258, %v429_v46  ;;  %v418_v58 = vmul.f32 %v417_v43, %v2077_v45  ;;  %v379_v60 = vadd.f32 0.18741608, %v378_v44  ;;  %v493_v2 = vadd.f32 0.00028619796, %v492_v55  ;;  %v224_v55 = vpop.f32.mrf.mxu0 }
  0xdc   :  { %v391_v41 = vmul.f32 %v390_v35, %v2069_v37  ;;  %v456_v51 = vmul.f32 %v455_v38, %v2092_v63  ;;  %v467_v54 = vmul.f32 %v466_v47, %v2092_v63  ;;  %v341_v4 = vadd.f32 1.1283791, %v340_v56 }
  0xdd   :  { %v431_v61 = vmul.f32 %v430_v53, %v2077_v45  ;;  %v419_v5 = vadd.f32 0.18741608, %v418_v58  ;;  %v2140_v10 = vmul.f32 0.5, %v2039_v13  ;;  %v2143_v11 = vmul.f32 0.5, %v2052_v23 }
  0xde   :  { %v2122_v50 = vadd.f32 1.0, %v391_v41  ;;  %v457_v62 = vadd.f32 0.05243302, %v456_v51  ;;  %v468_v0 = vadd.f32 0.112945676, %v467_v54  ;;  %v380_v12 = vmul.f32 %v379_v60, %v2069_v37 }
  0xdf   :  { %v2125_v52 = vpop.eup %1746  ;;  %v2136_v21 = vadd.f32 1.0, %v431_v61  ;;  %v2147_v16 = vmul.f32 0.5, %v2056_v27  ;;  %v2153_v18 = vmul.f32 0.5, %v2073_v42  ;;  %v503_v13 = vmul.f32 3.8918573e-05, %v2120_v49 }
  0xe0   :  { %v354_v57 = vmul.f32 %v2125_v52, %v2103_v22  ;;  %1748 = vrcp.f32 %v2122_v50  ;;  %v469_v7 = vmul.f32 %v468_v0, %v2092_v63  ;;  %v458_v19 = vmul.f32 %v457_v62, %v2092_v63 }
  0xe1   :  { %1750 = vrcp.f32 %v2136_v21  ;;  %v494_v37 = vmul.f32 %v493_v2, %v2120_v49  ;;  %v2161_v27 = vadd.f32 %v308_v8, %v280_v3  ;;  %v2164_v24 = vmul.f32 %v341_v4, %v2044_v15  ;;  %v282_v3 = vpop.f32.mrf.mxu2  ;;  %v1684_v4 = vld [vmem:[#allocation10 + $0x74] sm:$0xf] }
  0xe2   :  { %v355_v1 = vsub.f32 1.0, %v354_v57  ;;  %v362_v25 = vand.u32 2147483647, %v2103_v22  ;;  %v420_v42 = vmul.f32 %v419_v5, %v2077_v45  ;;  %v470_v29 = vadd.f32 0.4994258, %v469_v7 }
  0xe3   :  { %vm359_vm0 = vweird.f32 %v2125_v52  ;;  %v364_v30 = vand.u32 2147483648, %v2103_v22  ;;  %v381_v31 = vadd.f32 1.1283791, %v380_v12  ;;  %v402_v34 = vand.u32 2147483647, %v2122_v50 }
  0xe4   :  { %v356_v20 = vmul.f32 %v2125_v52, %v355_v1  ;;  %v404_v35 = vand.u32 2147483648, %v2122_v50  ;;  %v471_v36 = vmul.f32 %v470_v29, %v2092_v63  ;;  %v504_v38 = vadd.f32 0.001143296, %v503_v13 }
  0xe5   :  { %v459_v39 = vadd.f32 0.18741608, %v458_v19  ;;  %v495_v40 = vadd.f32 0.0036580483, %v494_v37  ;;  %v2175_v45 = vmul.f32 0.70710677, %v2161_v27  ;;  %vm358_vm1 = vweird.f32 %v2103_v22 }
  0xe6   :  { %v2149_v17 = vpop.eup %1748  ;;  %v357_v15 = vadd.f32 %v2125_v52, %v356_v20  ;;  %v421_v43 = vadd.f32 1.1283791, %v420_v42  ;;  %v2180_v44 = vadd.f32 1.0, %v471_v36  ;;  %v505_v46 = vmul.f32 %v504_v38, %v2120_v49  ;;  %vm2192_vm3 = vmor %vm358_vm1, %vm359_vm0  ;;  %v253_v20 = vpop.f32.mrf.mxu1  ;;  %v1600_v22 = vld [vmem:[#allocation10 + $0x70] sm:$0xf] }
  0xe7   :  { %v394_v23 = vmul.f32 %v2149_v17, %v2122_v50  ;;  %v2177_v41 = vpop.eup %1750  ;;  %vm2183_vm2 = vcmp.eq.f32.partialorder %v362_v25, 8.507059e+37  ;;  %v365_v51 = vor.u32 1.1754944e-38, %v364_v30  ;;  %v2197_v56 = vmul.f32 %v381_v31, %v2059_v28 }
  0xe8   :  { %v434_v54 = vmul.f32 %v2177_v41, %v2136_v21  ;;  %v444_v57 = vand.u32 2147483648, %v2136_v21  ;;  %1752 = vrcp.f32 %v2180_v44  ;;  %v530_v58 = vmul.f32 %v2175_v45, %v2175_v45 }
  0xe9   :  { %v395_v33 = vsub.f32 1.0, %v394_v23  ;;  %v361_v59 = vsel %vm2192_vm3, %v2125_v52, %v357_v15  ;;  %vm2206_vm4 = vcmp.eq.f32.partialorder %v402_v34, 8.507059e+37  ;;  %v405_v61 = vor.u32 1.1754944e-38, %v404_v35  ;;  %v1602_v52 = vld [vmem:[#allocation10 + $0x78] sm:$0xf0] }
  0xea   :  { %v460_v62 = vmul.f32 %v459_v39, %v2092_v63  ;;  %v496_v28 = vmul.f32 %v495_v40, %v2120_v49  ;;  %vm398_vm5 = vweird.f32 %v2122_v50  ;;  %v2214_v0 = vmul.f32 %v421_v43, %v2064_v32 }
  0xeb   :  { %v396_v53 = vmul.f32 %v2149_v17, %v395_v33  ;;  %v506_v1 = vadd.f32 0.014752088, %v505_v46  ;;  %v225_v2 = vadd.f32 %v224_v55, %v2036_v9  ;;  %vm399_vm6 = vweird.f32 %v2149_v17  ;;  %v311_v33 = vpop.f32.mrf.mxu3 }
  0xec   :  { %v435_v7 = vsub.f32 1.0, %v434_v54  ;;  %v442_v63 = vand.u32 2147483647, %v2136_v21  ;;  %v366_v8 = vsel %vm2183_vm2, %v365_v51, %v361_v59  ;;  %v2222_v12 = vor.u32 1.1754944e-38, %v444_v57  ;;  %vm2234_vm7 = vmor %vm398_vm5, %vm399_vm6 }
  0xed   :  { %v397_v5 = vadd.f32 %v2149_v17, %v396_v53  ;;  %v507_v32 = vmul.f32 %v506_v1, %v2120_v49  ;;  %v2225_v19 = vmin.f32 %v530_v58, 16.0  ;;  %v461_v9 = vadd.f32 1.1283791, %v460_v62 }
  0xee   :  { %v497_v13 = vadd.f32 0.05243302, %v496_v28  ;;  %v283_v23 = vadd.f32 %v282_v3, %v2041_v14  ;;  %v2228_v37 = vor.u32 %v1684_v4, %v1602_v52  ;;  %v2230_v25 = vpop.eup %1752  ;;  %vm438_vm8 = vweird.f32 %v2136_v21 }
  0xef   :  { %v508_v29 = vadd.f32 0.112945676, %v507_v32  ;;  %v532_v30 = vmul.f32 2.1237322e-06, %v2225_v19  ;;  %v543_v31 = vmul.f32 3.8918573e-05, %v2225_v19  ;;  %v2242_v14 = vmul.f32 %v366_v8, %v2164_v24 }
  0xf0   :  { %v401_v34 = vsel %vm2234_vm7, %v2149_v17, %v397_v5  ;;  %v436_v50 = vmul.f32 %v2177_v41, %v435_v7  ;;  %v474_v35 = vmul.f32 %v2230_v25, %v2180_v44  ;;  %920 = vmatpush.bf16.msrb.mxu2 %v2228_v37  ;;  %vm439_vm9 = vweird.f32 %v2177_v41 }
  0xf1   :  { %v509_v36 = vmul.f32 %v508_v29, %v2120_v49  ;;  %v533_v38 = vadd.f32 0.00028619796, %v532_v30  ;;  %v2253_v15 = vadd.f32 %v253_v20, %v225_v2  ;;  %vm2255_vm10 = vcmp.eq.f32.partialorder %v442_v63, 8.507059e+37  ;;  %vm2285_vm13 = vmor %vm438_vm8, %vm439_vm9  ;;  %v1701_v20 = vld [vmem:[#allocation10 + $0xf4] sm:$0xf0] }
  0xf2   :  { %v475_v39 = vsub.f32 1.0, %v474_v35  ;;  %vm478_vm11 = vweird.f32 %v2180_v44  ;;  %v544_v17 = vadd.f32 0.001143296, %v543_v31  ;;  %v2260_v40 = vadd.f32 %v311_v33, %v283_v23  ;;  %v1700_v31 = vld [vmem:[#allocation10 + $0xf4] sm:$0xf] }
  0xf3   :  { %v406_v43 = vsel %vm2206_vm4, %v405_v61, %v401_v34  ;;  %v498_v46 = vmul.f32 %v497_v13, %v2120_v49  ;;  %v510_v47 = vadd.f32 0.4994258, %v509_v36  ;;  %v534_v51 = vmul.f32 %v533_v38, %v2225_v19  ;;  %v1685_v61 = vld [vmem:[#allocation10 + $0x74] sm:$0xf0]  ;;  %v1664_v13 = vld [vmem:[#allocation10 + $0xf0] sm:$0xf] }
  0xf4   :  { %v437_v53 = vadd.f32 %v2177_v41, %v436_v50  ;;  %v476_v54 = vmul.f32 %v2230_v25, %v475_v39  ;;  %vm479_vm12 = vweird.f32 %v2230_v25  ;;  %v482_v55 = vand.u32 2147483647, %v2180_v44  ;;  %v1666_v33 = vld [vmem:[#allocation10 + $0xf8] sm:$0xf0]  ;;  %v1682_v35 = vld [vmem:[#allocation10 + $0x64] sm:$0xf] }
  0xf5   :  { %v511_v57 = vmul.f32 %v510_v47, %v2120_v49  ;;  %v535_v58 = vadd.f32 0.0036580483, %v534_v51  ;;  %v545_v59 = vmul.f32 %v544_v17, %v2225_v19  ;;  %v2273_v60 = vmul.f32 0.70710677, %v2253_v15  ;;  %vm2300_vm14 = vmor %vm478_vm11, %vm479_vm12  ;;  %v1594_v39 = vld [vmem:[#allocation10 + $0x68] sm:$0xf0] }
  0xf6   :  { %v407_v62 = vmul.f32 %v406_v43, %v2197_v56  ;;  %v477_v28 = vadd.f32 %v2230_v25, %v476_v54  ;;  %v484_v1 = vand.u32 2147483648, %v2180_v44  ;;  %v2279_v2 = vmul.f32 0.70710677, %v2260_v40 }
  0xf7   :  { %v499_v4 = vadd.f32 0.18741608, %v498_v46  ;;  %v2289_v52 = vadd.f32 1.0, %v511_v57  ;;  %v546_v5 = vadd.f32 0.014752088, %v545_v59  ;;  %v570_v56 = vmul.f32 %v2273_v60, %v2273_v60 }
  0xf8   :  { %v441_v7 = vsel %vm2285_vm13, %v2177_v41, %v437_v53  ;;  %v536_v63 = vmul.f32 %v535_v58, %v2225_v19  ;;  %v610_v8 = vmul.f32 %v2279_v2, %v2279_v2  ;;  %v2307_v32 = vor.u32 %v1685_v61, %v1600_v22  ;;  %v1592_v58 = vld [vmem:[#allocation10 + $0x60] sm:$0xf] }
  0xf9   :  { %v1534_v23 = vclamps-f32 %v2242_v14, 1.0  ;;  %v481_v41 = vsel %vm2300_vm14, %v2230_v25, %v477_v28  ;;  %vm483_vm15 = vcmp.eq.f32.partialorder %v482_v55, 8.507059e+37  ;;  %1754 = vrcp.f32 %v2289_v52 }
  0xfa   :  { %v1535_v44 = vclamps-f32 %v407_v62, 1.0  ;;  %v462_v42 = vmul.f32 %v461_v9, %v2081_v48  ;;  %v485_v29 = vor.u32 1.1754944e-38, %v484_v1  ;;  %v547_v30 = vmul.f32 %v546_v5, %v2225_v19  ;;  %882 = vmatpush.bf16.msrb.mxu0 %v2307_v32 }
  0xfb   :  { %v446_v14 = vsel %vm2255_vm10, %v2222_v12, %v441_v7  ;;  %v2320_v34 = vmin.f32 %v570_v56, 16.0  ;;  %v2322_v25 = vmin.f32 %v610_v8, 16.0  ;;  %v2324_v50 = vor.u32 %v1701_v20, %v1664_v13  ;;  %v1656_v56 = vld [vmem:[#allocation10 + $0xe0] sm:$0xf]  ;;  %v1699_v7 = vld [vmem:[#allocation10 + $0xe4] sm:$0xf0] }
  0xfc   :  { %v486_v36 = vsel %vm483_vm15, %v485_v29, %v481_v41  ;;  %v500_v48 = vmul.f32 %v499_v4, %v2120_v49  ;;  %v537_v9 = vadd.f32 0.05243302, %v536_v63  ;;  %v548_v38 = vadd.f32 0.112945676, %v547_v30  ;;  %v1698_v20 = vld [vmem:[#allocation10 + $0xe4] sm:$0xf] }
  0xfd   :  { %v572_v17 = vmul.f32 2.1237322e-06, %v2320_v34  ;;  %v583_v43 = vmul.f32 3.8918573e-05, %v2320_v34  ;;  %v612_v24 = vmul.f32 2.1237322e-06, %v2322_v25  ;;  %901 = vmatpush.bf16.msrb.mxu1 %v2324_v50  ;;  %v2331_v12 = vor.u32 %v1700_v31, %v1666_v33 }
  0xfe   :  { %v650_v46 = vadd.f32 1.0, %v1534_v23  ;;  %v651_v47 = vadd.f32 1.0, %v1535_v44  ;;  %v447_v51 = vmul.f32 %v446_v14, %v2214_v0  ;;  %v549_v53 = vmul.f32 %v548_v38, %v2225_v19  ;;  %v1683_v0 = vld [vmem:[#allocation10 + $0x64] sm:$0xf0]  ;;  %v1658_v23 = vld [vmem:[#allocation10 + $0xe8] sm:$0xf0] }
  0xff   :  { %v2335_v49 = vpop.eup %1754  ;;  %v573_v54 = vadd.f32 0.00028619796, %v572_v17  ;;  %v584_v55 = vadd.f32 0.001143296, %v583_v43  ;;  %v613_v22 = vadd.f32 0.00028619796, %v612_v24  ;;  %939 = vmatpush.bf16.msrb.mxu3 %v2331_v12  ;;  %v2338_v57 = vor.u32 %v1682_v35, %v1594_v39 }
 0x100   :  { %v487_v59 = vmul.f32 %v486_v36, %v462_v42  ;;  %v501_v61 = vadd.f32 1.1283791, %v500_v48  ;;  %v514_v62 = vmul.f32 %v2335_v49, %v2289_v52  ;;  %v623_v28 = vmul.f32 3.8918573e-05, %v2322_v25  ;;  %v1680_v17 = vld [vmem:[#allocation10 + $0x54] sm:$0xf] }
 0x101   :  { %v538_v1 = vmul.f32 %v537_v9, %v2225_v19  ;;  %v550_v3 = vadd.f32 0.4994258, %v549_v53  ;;  %v574_v4 = vmul.f32 %v573_v54, %v2320_v34  ;;  %v585_v5 = vmul.f32 %v584_v55, %v2320_v34  ;;  %921 = vmatpush.bf16.msrb.mxu2 %v2338_v57  ;;  %v1586_v43 = vld [vmem:[#allocation10 + $0x58] sm:$0xf0]  ;;  %v1584_v24 = vld [vmem:[#allocation10 + $0x50] sm:$0xf] }
 0x102   :  { %v2348_v21 = vmul.f32 %v650_v46, %v2140_v10  ;;  %v2351_v63 = vmul.f32 %v651_v47, %v2143_v11  ;;  %v1536_v8 = vclamps-f32 %v447_v51, 1.0  ;;  %v614_v13 = vmul.f32 %v613_v22, %v2322_v25  ;;  %v1681_v46 = vld [vmem:[#allocation10 + $0x54] sm:$0xf0]  ;;  %v1648_v47 = vld [vmem:[#allocation10 + $0xd0] sm:$0xf] }
 0x103   :  { %v524_v41 = vand.u32 2147483648, %v2289_v52  ;;  %v551_v44 = vmul.f32 %v550_v3, %v2225_v19  ;;  %v575_v42 = vadd.f32 0.0036580483, %v574_v4  ;;  %v586_v29 = vadd.f32 0.014752088, %v585_v5 }
 0x104   :  { %v1537_v30 = vclamps-f32 %v487_v59, 1.0  ;;  %v515_v31 = vsub.f32 1.0, %v514_v62  ;;  %v624_v33 = vadd.f32 0.001143296, %v623_v28  ;;  %v2356_v14 = vor.u32 %v1683_v0, %v1592_v58  ;;  %v1697_v51 = vld [vmem:[#allocation10 + $0xd4] sm:$0xf0] }
 0x105   :  { %v539_v10 = vadd.f32 0.18741608, %v538_v1  ;;  %v2358_v35 = vadd.f32 1.0, %v551_v44  ;;  %v576_v11 = vmul.f32 %v575_v42, %v2320_v34  ;;  %v587_v36 = vmul.f32 %v586_v29, %v2320_v34  ;;  %v1696_v54 = vld [vmem:[#allocation10 + $0xd4] sm:$0xf] }
 0x106   :  { %v615_v48 = vadd.f32 0.0036580483, %v614_v13  ;;  %v625_v9 = vmul.f32 %v624_v33, %v2322_v25  ;;  %883 = vmatpush.bf16.msrb.mxu0 %v2356_v14  ;;  %v2364_v38 = vor.u32 %v1699_v7, %v1656_v56  ;;  %v2366_v39 = vor.u32 %v1698_v20, %v1658_v23  ;;  %v1650_v55 = vld [vmem:[#allocation10 + $0xd8] sm:$0xf0]  ;;  %v1678_v28 = vld [vmem:[#allocation10 + $0x44] sm:$0xf] }
 0x107   :  { %v522_v53 = vand.u32 2147483647, %v2289_v52  ;;  %1756 = vrcp.f32 %v2358_v35  ;;  %v2372_v22 = vpack.c.bf16 %v2351_v63, %v2348_v21  ;;  %v2375_v58 = vmul.f32 %v501_v61, %v2108_v26  ;;  %v1578_v0 = vld [vmem:[#allocation10 + $0x48] sm:$0xf0]  ;;  %v1576_v13 = vld [vmem:[#allocation10 + $0x40] sm:$0xf] }
 0x108   :  { %v516_v59 = vmul.f32 %v2335_v49, %v515_v31  ;;  %v588_v62 = vadd.f32 0.112945676, %v587_v36  ;;  %902 = vmatpush.bf16.msrb.mxu1 %v2364_v38  ;;  %940 = vmatpush.bf16.msrb.mxu3 %v2366_v39  ;;  %v652_v1 = vadd.f32 1.0, %v1536_v8  ;;  %v2380_v3 = vor.u32 1.1754944e-38, %v524_v41  ;;  %v1679_v20 = vld [vmem:[#allocation10 + $0x44] sm:$0xf0] }
 0x109   :  { %3003 = vst [vmem:[#allocation19_spill] sm:$0xff] %v2372_v22  ;;  %v577_v4 = vadd.f32 0.05243302, %v576_v11  ;;  %v626_v5 = vadd.f32 0.014752088, %v625_v9  ;;  %v2382_v56 = vadd.f32 1.0, %v1537_v30  ;;  %v540_v7 = vmul.f32 %v539_v10, %v2225_v19 }
 0x10a   :  { %v589_v26 = vmul.f32 %v588_v62, %v2320_v34  ;;  %v616_v61 = vmul.f32 %v615_v48, %v2322_v25  ;;  %vm2387_vm0 = vcmp.eq.f32.partialorder %v522_v53, 8.507059e+37  ;;  %v2392_v41 = vor.u32 %v1680_v17, %v1586_v43  ;;  %v1640_v29 = vld [vmem:[#allocation10 + $0xc0] sm:$0xf]  ;;  %v1695_v19 = vld [vmem:[#allocation10 + $0xc4] sm:$0xf0] }
 0x10b   :  { %v627_v8 = vmul.f32 %v626_v5, %v2322_v25  ;;  %v2394_v44 = vor.u32 %v1681_v46, %v1584_v24  ;;  %v2396_v42 = vor.u32 %v1697_v51, %v1648_v47  ;;  %v517_v30 = vadd.f32 %v2335_v49, %v516_v59  ;;  %v1694_v10 = vld [vmem:[#allocation10 + $0xc4] sm:$0xf]  ;;  %v1642_v11 = vld [vmem:[#allocation10 + $0xc8] sm:$0xf0]  ;;  %v1676_v24 = vld [vmem:[#allocation10 + $0x34] sm:$0xf] }
 0x10c   :  { %vm519_vm1 = vweird.f32 %v2335_v49  ;;  %v590_v31 = vadd.f32 0.4994258, %v589_v26  ;;  %v2400_v33 = vor.u32 %v1696_v54, %v1650_v55  ;;  %v578_v48 = vmul.f32 %v577_v4, %v2320_v34  ;;  %922 = vmatpush.bf16.msrb.mxu2 %v2392_v41  ;;  %v1570_v46 = vld [vmem:[#allocation10 + $0x38] sm:$0xf0]  ;;  %v1568_v54 = vld [vmem:[#allocation10 + $0x30] sm:$0xf] }
 0x10d   :  { %v2402_v36 = vpop.eup %1756  ;;  %v628_v9 = vadd.f32 0.112945676, %v627_v8  ;;  %884 = vmatpush.bf16.msrb.mxu0 %v2394_v44  ;;  %v2407_v17 = vor.u32 %v1678_v28, %v1578_v0  ;;  %v2409_v43 = vor.u32 %v1679_v20, %v1576_v13  ;;  %v2412_v47 = vmul.f32 %v652_v1, %v2147_v16  ;;  %903 = vmatpush.bf16.msrb.mxu1 %v2396_v42  ;;  %v1677_v55 = vld [vmem:[#allocation10 + $0x34] sm:$0xf0]  ;;  %v1632_v0 = vld [vmem:[#allocation10 + $0xb0] sm:$0xf] }
 0x10e   :  { %vm518_vm2 = vweird.f32 %v2289_v52  ;;  %v2415_v51 = vadd.f32 1.1283791, %v540_v7  ;;  %v554_v53 = vmul.f32 %v2402_v36, %v2358_v35  ;;  %941 = vmatpush.bf16.msrb.mxu3 %v2400_v33  ;;  %v591_v16 = vmul.f32 %v590_v31, %v2320_v34  ;;  %v1693_v1 = vld [vmem:[#allocation10 + $0xb4] sm:$0xf0]  ;;  %v1692_v13 = vld [vmem:[#allocation10 + $0xb4] sm:$0xf] }
 0x10f   :  { %vm2423_vm3 = vmor %vm518_vm2, %vm519_vm1  ;;  %v617_v52 = vadd.f32 0.05243302, %v616_v61  ;;  %v629_v62 = vmul.f32 %v628_v9, %v2322_v25  ;;  %v2429_v28 = vor.u32 %v1695_v19, %v1640_v29  ;;  %v564_v7 = vand.u32 2147483648, %v2358_v35  ;;  %v1634_v20 = vld [vmem:[#allocation10 + $0xb8] sm:$0xf0] }
 0x110   :  { %v521_v4 = vsel %vm2423_vm3, %v2335_v49, %v517_v30  ;;  %v555_v5 = vsub.f32 1.0, %v554_v53  ;;  %v2435_v26 = vor.u32 %v1694_v10, %v1642_v11  ;;  %v1674_v8 = vld [vmem:[#allocation10 + $0x24] sm:$0xf]  ;;  %v579_v31 = vadd.f32 0.18741608, %v578_v48  ;;  %923 = vmatpush.bf16.msrb.mxu2 %v2407_v17 }
 0x111   :  { %v2437_v61 = vadd.f32 1.0, %v591_v16  ;;  %v630_v9 = vadd.f32 0.4994258, %v629_v62  ;;  %885 = vmatpush.bf16.msrb.mxu0 %v2409_v43  ;;  %v2441_v29 = vor.u32 %v1676_v24, %v1570_v46  ;;  %vm559_vm4 = vweird.f32 %v2402_v36  ;;  %904 = vmatpush.bf16.msrb.mxu1 %v2429_v28  ;;  %v1562_v10 = vld [vmem:[#allocation10 + $0x28] sm:$0xf0] }
 0x112   :  { %v556_v49 = vmul.f32 %v2402_v36, %v555_v5  ;;  %v562_v19 = vand.u32 2147483647, %v2358_v35  ;;  %942 = vmatpush.bf16.msrb.mxu3 %v2435_v26  ;;  %v2448_v30 = vor.u32 %v1677_v55, %v1568_v54  ;;  %v1560_v11 = vld [vmem:[#allocation10 + $0x20] sm:$0xf]  ;;  %v2452_v48 = vmul.f32 %v2382_v56, %v2153_v18  ;;  %v1675_v46 = vld [vmem:[#allocation10 + $0x24] sm:$0xf0] }
 0x113   :  { %vm558_vm5 = vweird.f32 %v2358_v35  ;;  %1758 = vrcp.f32 %v2437_v61  ;;  %v618_v24 = vmul.f32 %v617_v52, %v2322_v25  ;;  %v1624_v53 = vld [vmem:[#allocation10 + $0xa0] sm:$0xf]  ;;  %v1691_v59 = vld [vmem:[#allocation10 + $0xa4] sm:$0xf0]  ;;  %v526_v54 = vsel %vm2387_vm0, %v2380_v3, %v521_v4  ;;  %v1690_v18 = vld [vmem:[#allocation10 + $0xa4] sm:$0xf] }
 0x114   :  { %v557_v55 = vadd.f32 %v2402_v36, %v556_v49  ;;  %v631_v16 = vmul.f32 %v630_v9, %v2322_v25  ;;  %v2462_v62 = vor.u32 %v1693_v1, %v1632_v0  ;;  %v1626_v56 = vld [vmem:[#allocation10 + $0xa8] sm:$0xf0]  ;;  %vm2466_vm6 = vmor %vm558_vm5, %vm559_vm4  ;;  %v565_v52 = vor.u32 1.1754944e-38, %v564_v7  ;;  %924 = vmatpush.bf16.msrb.mxu2 %v2441_v29  ;;  %v1672_v0 = vld [vmem:[#allocation10 + $0x14] sm:$0xf] }
 0x115   :  { %v580_v5 = vmul.f32 %v579_v31, %v2320_v34  ;;  %886 = vmatpush.bf16.msrb.mxu0 %v2448_v30  ;;  %v2473_v3 = vor.u32 %v1692_v13, %v1634_v20  ;;  %v2475_v23 = vor.u32 %v1674_v8, %v1562_v10  ;;  %v1554_v1 = vld [vmem:[#allocation10 + $0x18] sm:$0xf0]  ;;  %v2483_v7 = vor.u32 %v1675_v46, %v1560_v11  ;;  %v1552_v31 = vld [vmem:[#allocation10 + $0x10] sm:$0xf]  ;;  %v1673_v49 = vld [vmem:[#allocation10 + $0x14] sm:$0xf0] }
 0x116   :  { %3008 = vst [vmem:[#allocation20_spill] sm:$0xff] %v2462_v62  ;;  %v561_v4 = vsel %vm2466_vm6, %v2402_v36, %v557_v55  ;;  %v2480_v9 = vadd.f32 1.0, %v631_v16  ;;  %905 = vmatpush.bf16.msrb.mxu1 %v2462_v62  ;;  %v2485_v34 = vor.u32 %v1691_v59, %v1624_v53  ;;  %v2488_v13 = vmul.f32 %v526_v54, %v2375_v58  ;;  %v1616_v10 = vld [vmem:[#allocation10 + $0x90] sm:$0xf]  ;;  %v1689_v36 = vld [vmem:[#allocation10 + $0x94] sm:$0xf0] }
 0x117   :  { %3011 = vst [vmem:[#allocation21_spill] sm:$0xff] %v2473_v3  ;;  %v619_v20 = vadd.f32 0.18741608, %v618_v24  ;;  %943 = vmatpush.bf16.msrb.mxu3 %v2473_v3  ;;  %v2491_v8 = vor.u32 %v1690_v18, %v1626_v56  ;;  %v2495_v55 = vpack.c.bf16 %v2452_v48, %v2412_v47  ;;  %v542_v11 = vmul.f32 %v2415_v51, %v2175_v45  ;;  %v1688_v46 = vld [vmem:[#allocation10 + $0x94] sm:$0xf] }
 0x118   :  { %3012 = vst [vmem:[#allocation22_spill] sm:$0xff] %v2475_v23  ;;  %vm563_vm7 = vcmp.eq.f32.partialorder %v562_v19, 8.507059e+37  ;;  %1760 = vrcp.f32 %v2480_v9  ;;  %v1618_v58 = vld [vmem:[#allocation10 + $0x98] sm:$0xf0]  ;;  %v581_v59 = vadd.f32 1.1283791, %v580_v5  ;;  %925 = vmatpush.bf16.msrb.mxu2 %v2475_v23  ;;  %v2504_v54 = vor.u32 %v1672_v0, %v1554_v1 }
 0x119   :  { %3013 = vst [vmem:[#allocation23_spill] sm:$0xff] %v2483_v7  ;;  %v2500_v53 = vpop.eup %1758  ;;  %v566_v24 = vsel %vm563_vm7, %v565_v52, %v561_v4  ;;  %887 = vmatpush.bf16.msrb.mxu0 %v2483_v7  ;;  %v2506_v16 = vor.u32 %v1673_v49, %v1552_v31  ;;  %v1670_v18 = vld [vmem:[#allocation10 + $0x4] sm:$0xf]  ;;  %v1546_v56 = vld [vmem:[#allocation10 + $0x8] sm:$0xf0]  ;;  %v2512_v19 = vor.u32 %v1689_v36, %v1616_v10  ;;  %v702_v5 = vunpack.c.l.bf16 %v2372_v22 }
 0x11a   :  { %3014 = vst [vmem:[#allocation24_spill] sm:$0xff] %v2485_v34  ;;  %v594_v45 = vmul.f32 %v2500_v53, %v2437_v61  ;;  %v602_v51 = vand.u32 2147483647, %v2437_v61  ;;  %906 = vmatpush.bf16.msrb.mxu1 %v2485_v34  ;;  %v1544_v35 = vld [vmem:[#allocation10] sm:$0xf]  ;;  %v1538_v0 = vclamps-f32 %v2488_v13, 1.0  ;;  %v620_v4 = vmul.f32 %v619_v20, %v2322_v25 }
 0x11b   :  { %v1671_v52 = vld [vmem:[#allocation10 + $0x4] sm:$0xf0]  ;;  %v604_v1 = vand.u32 2147483648, %v2437_v61  ;;  %944 = vmatpush.bf16.msrb.mxu3 %v2491_v8  ;;  %v2519_v31 = vor.u32 %v1688_v46, %v1618_v58  ;;  %v1608_v49 = vld [vmem:[#allocation10 + $0x80] sm:$0xf]  ;;  %v567_v23 = vmul.f32 %v566_v24, %v542_v11  ;;  %v2521_v10 = vor.u32 %v1670_v18, %v1546_v56 }
 0x11c   :  { %v1687_v7 = vld [vmem:[#allocation10 + $0x84] sm:$0xf0]  ;;  %v595_v34 = vsub.f32 1.0, %v594_v45  ;;  %v1686_v36 = vld [vmem:[#allocation10 + $0x84] sm:$0xf]  ;;  %v704_v3 = vunpack.c.l.bf16 %v2495_v55  ;;  %vm599_vm8 = vweird.f32 %v2500_v53  ;;  %926 = vmatpush.bf16.msrb.mxu2 %v2504_v54  ;;  %v2527_v25 = vor.u32 %v1671_v52, %v1544_v35 }
 0x11d   :  { %v1610_v62 = vld [vmem:[#allocation10 + $0x88] sm:$0xf0]  ;;  %888 = vmatpush.bf16.msrb.mxu0 %v2506_v16  ;;  %v703_v13 = vunpack.c.h.bf16 %v2372_v22  ;;  %v705_v20 = vunpack.c.h.bf16 %v2495_v55  ;;  %v2533_v58 = vor.u32 %v1687_v7, %v1608_v49  ;;  %v710_v24 = vsub.f32 %v2348_v21, %v702_v5 }
 0x11e   :  { %v1761_v11 = vpop.eup %1760  ;;  %v596_v46 = vmul.f32 %v2500_v53, %v595_v34  ;;  %907 = vmatpush.bf16.msrb.mxu1 %v2512_v19  ;;  %v712_v18 = vsub.f32 %v2412_v47, %v704_v3  ;;  %v2539_v45 = vor.u32 %v1686_v36, %v1610_v62  ;;  %vm598_vm9 = vweird.f32 %v2437_v61 }
 0x11f   :  { %v634_v56 = vmul.f32 %v1761_v11, %v2480_v9  ;;  %945 = vmatpush.bf16.msrb.mxu3 %v2519_v31  ;;  %v711_v35 = vsub.f32 %v2351_v63, %v703_v13  ;;  %v713_v52 = vsub.f32 %v2452_v48, %v705_v20  ;;  %v621_v7 = vadd.f32 1.1283791, %v620_v4  ;;  %vm600_vm10 = vmor %vm598_vm9, %vm599_vm8 }
 0x120   :  { %v597_v34 = vadd.f32 %v2500_v53, %v596_v46  ;;  %v718_v49 = vpack.c.bf16 %v712_v18, %v710_v24  ;;  %v1539_v22 = vclamps-f32 %v567_v23, 1.0  ;;  %v605_v3 = vor.u32 1.1754944e-38, %v604_v1  ;;  %927 = vmatpush.bf16.msrb.mxu2 %v2521_v10 }
 0x121   :  { %v635_v5 = vsub.f32 1.0, %v634_v56  ;;  %889 = vmatpush.bf16.msrb.mxu0 %v2527_v25  ;;  %v719_v62 = vpack.c.bf16 %v713_v52, %v711_v35  ;;  %v582_v36 = vmul.f32 %v581_v59, %v2273_v60  ;;  %vm603_vm11 = vcmp.eq.f32.partialorder %v602_v51, 8.507059e+37 }
 0x122   :  { %v601_v13 = vsel %vm600_vm10, %v2500_v53, %v597_v34  ;;  %v644_v61 = vand.u32 2147483648, %v2480_v9  ;;  %908 = vmatpush.bf16.msrb.mxu1 %v2533_v58  ;;  %vm639_vm12 = vweird.f32 %v1761_v11  ;;  %v642_v1 = vand.u32 2147483647, %v2480_v9 }
 0x123   :  { %v606_v23 = vsel %vm603_vm11, %v605_v3, %v601_v13  ;;  %v636_v4 = vmul.f32 %v1761_v11, %v635_v5  ;;  %946 = vmatpush.bf16.msrb.mxu3 %v2539_v45  ;;  %928 = vmatmul.bf16.vlgmr.msrb.gmra.mxu2 %v718_v49  ;;  %v655_v60 = vadd.f32 1.0, %v1539_v22  ;;  %vm638_vm13 = vweird.f32 %v2480_v9 }
 0x124   :  { %1016 = vmatpush.bf16.msra.mxu2 %v2228_v37  ;;  %v607_v20 = vmul.f32 %v606_v23, %v582_v36  ;;  %890 = vmatmul.bf16.vlgmr.msrb.gmra.mxu0 %v718_v49  ;;  %v654_v59 = vadd.f32 1.0, %v1538_v0  ;;  %v319_v51 = vmul.f32 0.5, %v2161_v27  ;;  %vm640_vm14 = vmor %vm638_vm13, %vm639_vm12  ;;  %v645_v46 = vor.u32 1.1754944e-38, %v644_v61 }
 0x125   :  { %978 = vmatpush.bf16.msra.mxu0 %v2307_v32  ;;  %v637_v53 = vadd.f32 %v1761_v11, %v636_v4  ;;  %909 = vmatmul.bf16.vlgmr.msrb.gmra.mxu1 %v719_v62  ;;  %v622_v18 = vmul.f32 %v621_v7, %v2279_v2  ;;  %vm643_vm15 = vcmp.eq.f32.partialorder %v642_v1, 8.507059e+37  ;;  %v318_v9 = vmul.f32 0.5, %v2097_v6  ;;  %v3015_v1 = vld [vmem:[#allocation21_spill] sm:$0xff] }
 0x126   :  { %947 = vmatmul.bf16.vlgmr.msrb.gmra.mxu3 %v719_v62  ;;  %997 = vmatpush.bf16.msra.mxu1 %v2324_v50  ;;  %v1540_v24 = vclamps-f32 %v607_v20, 1.0  ;;  %v2565_v0 = vmul.f32 %v655_v60, %v319_v51  ;;  %v320_v6 = vmul.f32 0.5, %v2253_v15  ;;  %v321_v34 = vmul.f32 0.5, %v2260_v40  ;;  %v3016_v20 = vld [vmem:[#allocation20_spill] sm:$0xff]  ;;  %v3018_v51 = vld [vmem:[#allocation23_spill] sm:$0xff] }
 0x127   :  { %1035 = vmatpush.bf16.msra.mxu3 %v2331_v12  ;;  %v641_v56 = vsel %vm640_vm14, %v1761_v11, %v637_v53  ;;  %v2569_v35 = vmul.f32 %v654_v59, %v318_v9  ;;  %v3017_v59 = vld [vmem:[#allocation22_spill] sm:$0xff] }
 0x128   :  { %1017 = vmatpush.bf16.msra.mxu2 %v2338_v57  ;;  %v646_v22 = vsel %vm643_vm15, %v645_v46, %v641_v56  ;;  %v656_v52 = vadd.f32 1.0, %v1540_v24  ;;  %v3019_v46 = vld [vmem:[#allocation24_spill] sm:$0xff]  ;;  %v964_v24 = vunpack.c.l.b16 %v2495_v55  ;;  %v3020_v56 = vld [vmem:[#allocation19_spill] sm:$0xff] }
 0x129   :  { %979 = vmatpush.bf16.msra.mxu0 %v2356_v14  ;;  %v647_v27 = vmul.f32 %v646_v22, %v622_v18  ;;  %v2575_v11 = vpack.c.bf16 %v2565_v0, %v2569_v35  ;;  %v965_v18 = vunpack.c.h.b16 %v2495_v55  ;;  %v962_v22 = vunpack.c.l.b16 %v3020_v56 }
 0x12a   :  { %998 = vmatpush.bf16.msra.mxu1 %v2364_v38  ;;  %v2581_v49 = vmul.f32 %v656_v52, %v320_v6  ;;  %v963_v9 = vunpack.c.h.b16 %v3020_v56 }
 0x12b   :  { %1036 = vmatpush.bf16.msra.mxu3 %v2366_v39  ;;  %v1541_v2 = vclamps-f32 %v647_v27, 1.0  ;;  %v706_v15 = vunpack.c.l.bf16 %v2575_v11  ;;  %v707_v40 = vunpack.c.h.bf16 %v2575_v11  ;;  %v970_v27 = vpack.c.b16 %v964_v24, %v962_v22 }
 0x12c   :  { %1018 = vmatpush.bf16.msra.mxu2 %v2392_v41  ;;  %v971_v52 = vpack.c.b16 %v965_v18, %v963_v9  ;;  %v966_v6 = vunpack.c.l.b16 %v2575_v11 }
 0x12d   :  { %980 = vmatpush.bf16.msra.mxu0 %v2394_v44  ;;  %v657_v7 = vadd.f32 1.0, %v1541_v2  ;;  %v714_v13 = vsub.f32 %v2569_v35, %v706_v15  ;;  %v715_v23 = vsub.f32 %v2565_v0, %v707_v40 }
 0x12e   :  { %999 = vmatpush.bf16.msra.mxu1 %v2396_v42 }
 0x12f   :  { %1037 = vmatpush.bf16.msra.mxu3 %v2400_v33  ;;  %v2583_v3 = vmul.f32 %v657_v7, %v321_v34  ;;  %v967_v34 = vunpack.c.h.b16 %v2575_v11  ;;  %v1057_v7 = vmul.f32 %v2452_v48, %v2452_v48  ;;  %v1056_v11 = vmul.f32 %v2412_v47, %v2412_v47 }
 0x130   :  { %1019 = vmatpush.bf16.msra.mxu2 %v2407_v17 }
 0x131   :  { %981 = vmatpush.bf16.msra.mxu0 %v2409_v43  ;;  %v2589_v5 = vpack.c.bf16 %v2583_v3, %v2581_v49 }
 0x132   :  { %1000 = vmatpush.bf16.msra.mxu1 %v2429_v28 }
 0x133   :  { %1038 = vmatpush.bf16.msra.mxu3 %v2435_v26  ;;  %v708_v62 = vunpack.c.l.bf16 %v2589_v5  ;;  %v709_v36 = vunpack.c.h.bf16 %v2589_v5  ;;  %v968_v55 = vunpack.c.l.b16 %v2589_v5  ;;  %v969_v2 = vunpack.c.h.b16 %v2589_v5 }
 0x134   :  { %1020 = vmatpush.bf16.msra.mxu2 %v2441_v29  ;;  %v1055_v5 = vmul.f32 %v2351_v63, %v2351_v63 }
 0x135   :  { %982 = vmatpush.bf16.msra.mxu0 %v2448_v30  ;;  %v716_v61 = vsub.f32 %v2581_v49, %v708_v62  ;;  %v717_v4 = vsub.f32 %v2583_v3, %v709_v36  ;;  %v972_v15 = vpack.c.b16 %v968_v55, %v966_v6  ;;  %v973_v40 = vpack.c.b16 %v969_v2, %v967_v34 }
 0x136   :  { %1001 = vmatpush.bf16.msra.mxu1 %v3016_v20  ;;  %v1054_v62 = vmul.f32 %v2348_v21, %v2348_v21  ;;  %v2659_v36 = vpack.c.bf16 %v1057_v7, %v1056_v11 }
 0x137   :  { %1039 = vmatpush.bf16.msra.mxu3 %v3015_v1  ;;  %v720_v60 = vpack.c.bf16 %v716_v61, %v714_v13  ;;  %v721_v53 = vpack.c.bf16 %v717_v4, %v715_v23 }
 0x138   :  { %1021 = vmatpush.bf16.msra.mxu2 %v3017_v59  ;;  %v2663_v13 = vpack.c.bf16 %v1055_v5, %v1054_v62  ;;  %v1068_v61 = vunpack.c.l.bf16 %v2659_v36  ;;  %v1069_v23 = vunpack.c.h.bf16 %v2659_v36 }
 0x139   :  { %983 = vmatpush.bf16.msra.mxu0 %v3018_v51  ;;  %914 = vmatmul.bf16.gmra.mxu1 %v721_v53 }
 0x13a   :  { %895 = vmatmul.bf16.gmra.mxu0 %v720_v60  ;;  %933 = vmatmul.bf16.gmra.mxu2 %v720_v60  ;;  %v1066_v4 = vunpack.c.l.bf16 %v2663_v13  ;;  %v1067_v60 = vunpack.c.h.bf16 %v2663_v13  ;;  %v1077_v24 = vsub.f32 %v1057_v7, %v1069_v23 }
 0x13b   :  { %952 = vmatmul.bf16.gmra.mxu3 %v721_v53  ;;  %1002 = vmatpush.bf16.msra.mxu1 %v3019_v46  ;;  %v1076_v53 = vsub.f32 %v1056_v11, %v1068_v61 }
 0x13c   :  { %1040 = vmatpush.bf16.msra.mxu3 %v2491_v8  ;;  %1022 = vmatpush.bf16.msra.mxu2 %v2504_v54  ;;  %v1074_v18 = vsub.f32 %v1054_v62, %v1066_v4  ;;  %v1075_v56 = vsub.f32 %v1055_v5, %v1067_v60 }
 0x13d   :  { %984 = vmatpush.bf16.msra.mxu0 %v2506_v16 }
 0x13e   :  { %v1082_v22 = vpack.c.bf16 %v1076_v53, %v1074_v18 }
 0x13f   :  { %1003 = vmatpush.bf16.msra.mxu1 %v2512_v19 }
 0x140   :  { %1041 = vmatpush.bf16.msra.mxu3 %v2519_v31  ;;  %1023 = vmatpush.bf16.msra.mxu2 %v2521_v10 }
 0x141   :  { %985 = vmatpush.bf16.msra.mxu0 %v2527_v25 }
 0x143   :  { %1004 = vmatpush.bf16.msra.mxu1 %v2533_v58 }
 0x144   :  { %1124 = vmatpush.bf16.msrb.mxu2 %v2228_v37  ;;  %1042 = vmatpush.bf16.msra.mxu3 %v2539_v45 }
 0x145   :  { %1086 = vmatpush.bf16.msrb.mxu0 %v2307_v32 }
 0x147   :  { %1105 = vmatpush.bf16.msrb.mxu1 %v2324_v50 }
 0x148   :  { %1143 = vmatpush.bf16.msrb.mxu3 %v2331_v12  ;;  %1125 = vmatpush.bf16.msrb.mxu2 %v2338_v57 }
 0x149   :  { %1087 = vmatpush.bf16.msrb.mxu0 %v2356_v14  ;;  %1005 = vmatmul.bf16.vlgmr.msra.gmra.mxu1 %v971_v52 }
 0x14a   :  { %986 = vmatmul.bf16.vlgmr.msra.gmra.mxu0 %v970_v27  ;;  %1024 = vmatmul.bf16.vlgmr.msra.gmra.mxu2 %v970_v27 }
 0x14b   :  { %1106 = vmatpush.bf16.msrb.mxu1 %v2364_v38  ;;  %1043 = vmatmul.bf16.vlgmr.msra.gmra.mxu3 %v971_v52 }
 0x14c   :  { %1144 = vmatpush.bf16.msrb.mxu3 %v2366_v39  ;;  %1126 = vmatpush.bf16.msrb.mxu2 %v2392_v41 }
 0x14d   :  { %1088 = vmatpush.bf16.msrb.mxu0 %v2394_v44 }
 0x14f   :  { %1107 = vmatpush.bf16.msrb.mxu1 %v2396_v42 }
 0x150   :  { %1145 = vmatpush.bf16.msrb.mxu3 %v2400_v33  ;;  %1127 = vmatpush.bf16.msrb.mxu2 %v2407_v17 }
 0x151   :  { %1089 = vmatpush.bf16.msrb.mxu0 %v2409_v43 }
 0x153   :  { %1108 = vmatpush.bf16.msrb.mxu1 %v2429_v28 }
 0x154   :  { %1146 = vmatpush.bf16.msrb.mxu3 %v2435_v26  ;;  %1128 = vmatpush.bf16.msrb.mxu2 %v2441_v29 }
 0x155   :  { %1090 = vmatpush.bf16.msrb.mxu0 %v2448_v30 }
 0x157   :  { %1109 = vmatpush.bf16.msrb.mxu1 %v3016_v20 }
 0x158   :  { %1147 = vmatpush.bf16.msrb.mxu3 %v3015_v1  ;;  %1129 = vmatpush.bf16.msrb.mxu2 %v3017_v59 }
 0x159   :  { %1091 = vmatpush.bf16.msrb.mxu0 %v3018_v51  ;;  %1010 = vmatmul.bf16.gmra.mxu1 %v973_v40 }
 0x15a   :  { %991 = vmatmul.bf16.gmra.mxu0 %v972_v15  ;;  %1029 = vmatmul.bf16.gmra.mxu2 %v972_v15 }
 0x15b   :  { %1110 = vmatpush.bf16.msrb.mxu1 %v3019_v46  ;;  %1048 = vmatmul.bf16.gmra.mxu3 %v973_v40 }
 0x15c   :  { %1148 = vmatpush.bf16.msrb.mxu3 %v2491_v8  ;;  %1130 = vmatpush.bf16.msrb.mxu2 %v2504_v54 }
 0x15d   :  { %1092 = vmatpush.bf16.msrb.mxu0 %v2506_v16 }
 0x15f   :  { %1111 = vmatpush.bf16.msrb.mxu1 %v2512_v19 }
 0x160   :  { %1149 = vmatpush.bf16.msrb.mxu3 %v2519_v31  ;;  %1131 = vmatpush.bf16.msrb.mxu2 %v2521_v10 }
 0x161   :  { %1093 = vmatpush.bf16.msrb.mxu0 %v2527_v25 }
 0x163   :  { %1112 = vmatpush.bf16.msrb.mxu1 %v2533_v58 }
 0x164   :  { %1150 = vmatpush.bf16.msrb.mxu3 %v2539_v45  ;;  %1220 = vmatpush.bf16.msra.mxu2 %v2228_v37  ;;  %v1083_v37 = vpack.c.bf16 %v1077_v24, %v1075_v56 }
 0x165   :  { %1182 = vmatpush.bf16.msra.mxu0 %v2307_v32  ;;  %v1061_v32 = vmul.f32 %v2583_v3, %v2583_v3 }
 0x167   :  { %1201 = vmatpush.bf16.msra.mxu1 %v2324_v50  ;;  %v1059_v50 = vmul.f32 %v2565_v0, %v2565_v0 }
 0x168   :  { %1239 = vmatpush.bf16.msra.mxu3 %v2331_v12  ;;  %1221 = vmatpush.bf16.msra.mxu2 %v2338_v57  ;;  %v1060_v12 = vmul.f32 %v2581_v49, %v2581_v49  ;;  %v1058_v57 = vmul.f32 %v2569_v35, %v2569_v35 }
 0x169   :  { %1183 = vmatpush.bf16.msra.mxu0 %v2356_v14  ;;  %1113 = vmatmul.bf16.vlgmr.msrb.gmra.mxu1 %v1083_v37 }
 0x16a   :  { %1094 = vmatmul.bf16.vlgmr.msrb.gmra.mxu0 %v1082_v22  ;;  %1132 = vmatmul.bf16.vlgmr.msrb.gmra.mxu2 %v1082_v22  ;;  %v1065_v14 = vpack.c.bf16 %v1061_v32, %v1060_v12 }
 0x16b   :  { %1202 = vmatpush.bf16.msra.mxu1 %v2364_v38  ;;  %1151 = vmatmul.bf16.vlgmr.msrb.gmra.mxu3 %v1083_v37  ;;  %v1064_v38 = vpack.c.bf16 %v1059_v50, %v1058_v57 }
 0x16c   :  { %1240 = vmatpush.bf16.msra.mxu3 %v2366_v39  ;;  %1222 = vmatpush.bf16.msra.mxu2 %v2392_v41  ;;  %v1072_v39 = vunpack.c.l.bf16 %v1065_v14  ;;  %v1073_v9 = vunpack.c.h.bf16 %v1065_v14 }
 0x16d   :  { %1184 = vmatpush.bf16.msra.mxu0 %v2394_v44  ;;  %v1070_v41 = vunpack.c.l.bf16 %v1064_v38  ;;  %v1071_v44 = vunpack.c.h.bf16 %v1064_v38 }
 0x16e   :  { %v1080_v27 = vsub.f32 %v1060_v12, %v1072_v39  ;;  %v1081_v52 = vsub.f32 %v1061_v32, %v1073_v9 }
 0x16f   :  { %1203 = vmatpush.bf16.msra.mxu1 %v2396_v42  ;;  %v1078_v42 = vsub.f32 %v1058_v57, %v1070_v41 }
 0x170   :  { %1241 = vmatpush.bf16.msra.mxu3 %v2400_v33  ;;  %1223 = vmatpush.bf16.msra.mxu2 %v2407_v17  ;;  %v1079_v33 = vsub.f32 %v1059_v50, %v1071_v44 }
 0x171   :  { %1185 = vmatpush.bf16.msra.mxu0 %v2409_v43  ;;  %v1084_v17 = vpack.c.bf16 %v1080_v27, %v1078_v42 }
 0x172   :  { %v1085_v43 = vpack.c.bf16 %v1081_v52, %v1079_v33 }
 0x173   :  { %1204 = vmatpush.bf16.msra.mxu1 %v2429_v28  ;;  %v1168_v28 = vunpack.c.l.b16 %v2659_v36 }
 0x174   :  { %1242 = vmatpush.bf16.msra.mxu3 %v2435_v26  ;;  %1224 = vmatpush.bf16.msra.mxu2 %v2441_v29  ;;  %v1169_v26 = vunpack.c.h.b16 %v2659_v36  ;;  %v1166_v29 = vunpack.c.l.b16 %v2663_v13 }
 0x175   :  { %1186 = vmatpush.bf16.msra.mxu0 %v2448_v30  ;;  %v1167_v30 = vunpack.c.h.b16 %v2663_v13 }
 0x177   :  { %1205 = vmatpush.bf16.msra.mxu1 %v3016_v20 }
 0x178   :  { %1243 = vmatpush.bf16.msra.mxu3 %v3015_v1  ;;  %1225 = vmatpush.bf16.msra.mxu2 %v3017_v59 }
 0x179   :  { %1187 = vmatpush.bf16.msra.mxu0 %v3018_v51  ;;  %1118 = vmatmul.bf16.gmra.mxu1 %v1085_v43 }
 0x17a   :  { %1099 = vmatmul.bf16.gmra.mxu0 %v1084_v17  ;;  %1137 = vmatmul.bf16.gmra.mxu2 %v1084_v17 }
 0x17b   :  { %1206 = vmatpush.bf16.msra.mxu1 %v3019_v46  ;;  %1156 = vmatmul.bf16.gmra.mxu3 %v1085_v43 }
 0x17c   :  { %1244 = vmatpush.bf16.msra.mxu3 %v2491_v8  ;;  %1226 = vmatpush.bf16.msra.mxu2 %v2504_v54  ;;  %v1174_v8 = vpack.c.b16 %v1168_v28, %v1166_v29  ;;  %v1175_v54 = vpack.c.b16 %v1169_v26, %v1167_v30 }
 0x17d   :  { %1188 = vmatpush.bf16.msra.mxu0 %v2506_v16  ;;  %v1172_v16 = vunpack.c.l.b16 %v1065_v14 }
 0x17f   :  { %1207 = vmatpush.bf16.msra.mxu1 %v2512_v19  ;;  %v1173_v19 = vunpack.c.h.b16 %v1065_v14 }
 0x180   :  { %1245 = vmatpush.bf16.msra.mxu3 %v2519_v31  ;;  %1227 = vmatpush.bf16.msra.mxu2 %v2521_v10  ;;  %v1170_v31 = vunpack.c.l.b16 %v1064_v38  ;;  %v1171_v10 = vunpack.c.h.b16 %v1064_v38 }
 0x181   :  { %1189 = vmatpush.bf16.msra.mxu0 %v2527_v25 }
 0x182   :  { %v1176_v25 = vpack.c.b16 %v1172_v16, %v1170_v31 }
 0x183   :  { %1208 = vmatpush.bf16.msra.mxu1 %v2533_v58  ;;  %v1177_v58 = vpack.c.b16 %v1173_v19, %v1171_v10 }
 0x184   :  { %1246 = vmatpush.bf16.msra.mxu3 %v2539_v45 }
 0x189   :  { %1209 = vmatmul.bf16.vlgmr.msra.gmra.mxu1 %v1175_v54 }
 0x18a   :  { %1190 = vmatmul.bf16.vlgmr.msra.gmra.mxu0 %v1174_v8  ;;  %1228 = vmatmul.bf16.vlgmr.msra.gmra.mxu2 %v1174_v8 }
 0x18b   :  { %1247 = vmatmul.bf16.vlgmr.msra.gmra.mxu3 %v1175_v54 }
 0x199   :  { %1214 = vmatmul.bf16.gmra.mxu1 %v1177_v58 }
 0x19a   :  { %1195 = vmatmul.bf16.gmra.mxu0 %v1176_v25  ;;  %1233 = vmatmul.bf16.gmra.mxu2 %v1176_v25  ;;  %v1429_v25 = vld [vmem:[#allocation11 + $0x78] sm:$0xff] }
 0x19b   :  { %1252 = vmatmul.bf16.gmra.mxu3 %v1177_v58  ;;  %1450 = vmatpush.msrb.mxu0 %v1429_v25  ;;  %v1428_v58 = vld [vmem:[#allocation11 + $0x70] sm:$0xff] }
 0x19c   :  { %1702 = vmatpush.msrb.mxu2 %v1429_v25  ;;  %v1439_v25 = vld [vmem:[#allocation11 + $0xc8] sm:$0xff] }
 0x19d   :  { %1451 = vmatpush.msrb.mxu0 %v1428_v58 }
 0x19e   :  { %1703 = vmatpush.msrb.mxu2 %v1428_v58 }
 0x1a1   :  { %v891_v45 = vpop.f32.mrf.mxu0 }
 0x1a2   :  { %v910_v1 = vpop.f32.mrf.mxu1 }
 0x1a3   :  { %v2717_v20 = vadd.f32 %v910_v1, %v891_v45  ;;  %v1427_v45 = vld [vmem:[#allocation11 + $0x68] sm:$0xff] }
 0x1a4   :  { %1452 = vmatpush.msrb.mxu0 %v1427_v45  ;;  %1704 = vmatpush.msrb.mxu2 %v1427_v45 }
 0x1a6   :  { %v929_v59 = vpop.f32.mrf.mxu2 }
 0x1a9   :  { %v948_v51 = vpop.f32.mrf.mxu3  ;;  %v893_v46 = vpop.f32.mrf.mxu0 }
 0x1aa   :  { %v2719_v55 = vadd.f32 %v948_v51, %v929_v59  ;;  %v912_v2 = vpop.f32.mrf.mxu1 }
 0x1ab   :  { %v913_v6 = vadd.f32 %v912_v2, %v893_v46  ;;  %v1426_v2 = vld [vmem:[#allocation11 + $0x60] sm:$0xff] }
 0x1ac   :  { %1453 = vmatpush.msrb.mxu0 %v1426_v2  ;;  %1705 = vmatpush.msrb.mxu2 %v1426_v2  ;;  %v1438_v2 = vld [vmem:[#allocation11 + $0xc0] sm:$0xff] }
 0x1ae   :  { %v931_v34 = vpop.f32.mrf.mxu2 }
 0x1b1   :  { %v950_v7 = vpop.f32.mrf.mxu3 }
 0x1b2   :  { %v2721_v15 = vadd.f32 %v950_v7, %v931_v34  ;;  %v1425_v34 = vld [vmem:[#allocation11 + $0x58] sm:$0xff]  ;;  %v1444_v7 = vld [vmem:[#allocation11 + $0xf0] sm:$0xff] }
 0x1b3   :  { %1454 = vmatpush.msrb.mxu0 %v1425_v34  ;;  %1706 = vmatpush.msrb.mxu2 %v1425_v34 }
 0x1b6   :  { %v915_v5 = vpop.f32.mrf.mxu1 }
 0x1b7   :  { %v896_v40 = vpop.f32.mrf.mxu0 }
 0x1b8   :  { %v2723_v11 = vadd.f32 %v915_v5, %v896_v40  ;;  %v1424_v5 = vld [vmem:[#allocation11 + $0x50] sm:$0xff] }
 0x1b9   :  { %1455 = vmatpush.msrb.mxu0 %v1424_v5  ;;  %1707 = vmatpush.msrb.mxu2 %v1424_v5 }
 0x1bd   :  { %v934_v62 = vpop.f32.mrf.mxu2 }
 0x1be   :  { %v953_v36 = vpop.f32.mrf.mxu3  ;;  %v917_v23 = vpop.f32.mrf.mxu1 }
 0x1bf   :  { %v2725_v13 = vadd.f32 %v953_v36, %v934_v62  ;;  %v898_v61 = vpop.f32.mrf.mxu0  ;;  %v1443_v62 = vld [vmem:[#allocation11 + $0xe8] sm:$0xff] }
 0x1c0   :  { %v918_v4 = vadd.f32 %v917_v23, %v898_v61  ;;  %v1423_v36 = vld [vmem:[#allocation11 + $0x48] sm:$0xff]  ;;  %v1442_v61 = vld [vmem:[#allocation11 + $0xe0] sm:$0xff] }
 0x1c1   :  { %1456 = vmatpush.msrb.mxu0 %v1423_v36  ;;  %1708 = vmatpush.msrb.mxu2 %v1423_v36 }
 0x1c5   :  { %v936_v60 = vpop.f32.mrf.mxu2 }
 0x1c6   :  { %v955_v53 = vpop.f32.mrf.mxu3  ;;  %v2729_v56 = vpop.f32.mrf.mxu1 }
 0x1c7   :  { %v2727_v24 = vadd.f32 %v955_v53, %v936_v60  ;;  %v987_v18 = vpop.f32.mrf.mxu0 }
 0x1c8   :  { %v988_v40 = vadd.f32 %v987_v18, %v2717_v20 }
 0x1ca   :  { %v2781_v23 = vadd.f32 %v2729_v56, %v988_v40 }
 0x1cd   :  { %v2731_v22 = vpop.f32.mrf.mxu2 }
 0x1ce   :  { %v2733_v37 = vpop.f32.mrf.mxu3  ;;  %v1008_v50 = vpop.f32.mrf.mxu1  ;;  %v1026_v56 = vadd.f32 %v2731_v22, %v2719_v55  ;;  %v1419_v22 = vld [vmem:[#allocation11 + $0x28] sm:$0xff] }
 0x1cf   :  { %v989_v32 = vpop.f32.mrf.mxu0 }
 0x1d0   :  { %v990_v12 = vadd.f32 %v989_v32, %v913_v6  ;;  %v1445_v6 = vld [vmem:[#allocation11 + $0xf8] sm:$0xff]  ;;  %v1422_v32 = vld [vmem:[#allocation11 + $0x40] sm:$0xff]  ;;  %v2792_v45 = vadd.f32 %v2733_v37, %v1026_v56  ;;  %v1435_v56 = vld [vmem:[#allocation11 + $0xa8] sm:$0xff] }
 0x1d1   :  { %1479 = vmatpush.msrb.mxu1 %v1445_v6  ;;  %1718 = vmatpush.msrb.mxu3 %v1445_v6  ;;  %v1418_v37 = vld [vmem:[#allocation11 + $0x20] sm:$0xff] }
 0x1d2   :  { %v2735_v57 = vadd.f32 %v1008_v50, %v990_v12  ;;  %v1441_v50 = vld [vmem:[#allocation11 + $0xd8] sm:$0xff]  ;;  %1457 = vmatpush.msrb.mxu0 %v1422_v32  ;;  %1709 = vmatpush.msrb.mxu2 %v1422_v32  ;;  %v1436_v32 = vld [vmem:[#allocation11 + $0xb0] sm:$0xff] }
 0x1d3   :  { %1480 = vmatpush.msrb.mxu1 %v1444_v7  ;;  %1719 = vmatpush.msrb.mxu3 %v1444_v7 }
 0x1d5   :  { %v2737_v14 = vpop.f32.mrf.mxu2  ;;  %1481 = vmatpush.msrb.mxu1 %v1443_v62  ;;  %1720 = vmatpush.msrb.mxu3 %v1443_v62 }
 0x1d6   :  { %v2739_v38 = vpop.f32.mrf.mxu3  ;;  %v2743_v9 = vpop.f32.mrf.mxu1 }
 0x1d7   :  { %v2741_v39 = vpop.f32.mrf.mxu0  ;;  %1482 = vmatpush.msrb.mxu1 %v1442_v61  ;;  %1721 = vmatpush.msrb.mxu3 %v1442_v61  ;;  %v1437_v61 = vld [vmem:[#allocation11 + $0xb8] sm:$0xff] }
 0x1d9   :  { %1483 = vmatpush.msrb.mxu1 %v1441_v50  ;;  %1722 = vmatpush.msrb.mxu3 %v1441_v50  ;;  %v1260_v50 = vmul.f32 %v2735_v57, %v2735_v57 }
 0x1dd   :  { %v2745_v41 = vpop.f32.mrf.mxu2 }
 0x1de   :  { %v2747_v44 = vpop.f32.mrf.mxu3  ;;  %v1013_v52 = vpop.f32.mrf.mxu1 }
 0x1df   :  { %v994_v27 = vpop.f32.mrf.mxu0 }
 0x1e0   :  { %v995_v42 = vadd.f32 %v994_v27, %v918_v4  ;;  %v1421_v27 = vld [vmem:[#allocation11 + $0x38] sm:$0xff] }
 0x1e1   :  { %1458 = vmatpush.msrb.mxu0 %v1421_v27  ;;  %1710 = vmatpush.msrb.mxu2 %v1421_v27 }
 0x1e2   :  { %v2749_v33 = vadd.f32 %v1013_v52, %v995_v42  ;;  %v1440_v52 = vld [vmem:[#allocation11 + $0xd0] sm:$0xff]  ;;  %v1258_v42 = vmul.f32 %v2781_v23, %v2781_v23 }
 0x1e3   :  { %1484 = vmatpush.msrb.mxu1 %v1440_v52  ;;  %1723 = vmatpush.msrb.mxu3 %v1440_v52  ;;  %v1031_v52 = vadd.f32 %v2745_v41, %v2725_v13  ;;  %v1414_v41 = vld [vmem:[#allocation11] sm:$0xff] }
 0x1e5   :  { %v2751_v17 = vpop.f32.mrf.mxu2  ;;  %1485 = vmatpush.msrb.mxu1 %v1439_v25  ;;  %1724 = vmatpush.msrb.mxu3 %v1439_v25  ;;  %v1434_v25 = vld [vmem:[#allocation11 + $0xa0] sm:$0xff] }
 0x1e6   :  { %v2753_v43 = vpop.f32.mrf.mxu3  ;;  %v1114_v26 = vpop.f32.mrf.mxu1 }
 0x1e7   :  { %v1095_v28 = vpop.f32.mrf.mxu0  ;;  %1486 = vmatpush.msrb.mxu1 %v1438_v2  ;;  %1725 = vmatpush.msrb.mxu3 %v1438_v2 }
 0x1e8   :  { %v1115_v4 = vadd.f32 %v1114_v26, %v1095_v28  ;;  %v1420_v26 = vld [vmem:[#allocation11 + $0x30] sm:$0xff] }
 0x1e9   :  { %1459 = vmatpush.msrb.mxu0 %v1420_v26  ;;  %1711 = vmatpush.msrb.mxu2 %v1420_v26  ;;  %v1415_v26 = vld [vmem:[#allocation11 + $0x8] sm:$0xff] }
 0x1ea   :  { %1487 = vmatpush.msrb.mxu1 %v1437_v61  ;;  %1726 = vmatpush.msrb.mxu3 %v1437_v61 }
 0x1eb   :  { %1460 = vmatpush.msrb.mxu0 %v1419_v22  ;;  %1712 = vmatpush.msrb.mxu2 %v1419_v22 }
 0x1ec   :  { %1488 = vmatpush.msrb.mxu1 %v1436_v32  ;;  %1727 = vmatpush.msrb.mxu3 %v1436_v32  ;;  %v1430_v32 = vld [vmem:[#allocation11 + $0x80] sm:$0xff] }
 0x1ed   :  { %v2755_v29 = vpop.f32.mrf.mxu2  ;;  %1461 = vmatpush.msrb.mxu0 %v1418_v37  ;;  %1713 = vmatpush.msrb.mxu2 %v1418_v37 }
 0x1ee   :  { %v2757_v30 = vpop.f32.mrf.mxu3  ;;  %v2761_v54 = vpop.f32.mrf.mxu1  ;;  %1489 = vmatpush.msrb.mxu1 %v1435_v56  ;;  %1728 = vmatpush.msrb.mxu3 %v1435_v56 }
 0x1ef   :  { %v2759_v8 = vpop.f32.mrf.mxu0  ;;  %v1153_v55 = vadd.f32 %v2757_v30, %v2755_v29  ;;  %v1028_v29 = vadd.f32 %v2737_v14, %v2721_v15 }
 0x1f0   :  { %v1117_v6 = vadd.f32 %v2761_v54, %v2759_v8  ;;  %v1259_v8 = vmul.f32 %v2792_v45, %v2792_v45  ;;  %v993_v54 = vadd.f32 %v2741_v39, %v2723_v11  ;;  %1490 = vmatpush.msrb.mxu1 %v1434_v25  ;;  %1729 = vmatpush.msrb.mxu3 %v1434_v25 }
 0x1f1   :  { %v2810_v11 = vadd.f32 %v2739_v38, %v1028_v29  ;;  %v1431_v29 = vld [vmem:[#allocation11 + $0x88] sm:$0xff] }
 0x1f2   :  { %v2813_v27 = vadd.f32 %v2743_v9, %v993_v54 }
 0x1f5   :  { %v2763_v16 = vpop.f32.mrf.mxu2 }
 0x1f6   :  { %v2765_v19 = vpop.f32.mrf.mxu3  ;;  %v2769_v10 = vpop.f32.mrf.mxu1 }
 0x1f7   :  { %v2767_v31 = vpop.f32.mrf.mxu0 }
 0x1f8   :  { %v1120_v38 = vadd.f32 %v2769_v10, %v2767_v31  ;;  %v1262_v10 = vmul.f32 %v2813_v27, %v2813_v27 }
 0x1fd   :  { %v2771_v1 = vpop.f32.mrf.mxu2 }
 0x1fe   :  { %v2773_v59 = vpop.f32.mrf.mxu3  ;;  %v2777_v46 = vpop.f32.mrf.mxu1 }
 0x1ff   :  { %v2775_v51 = vpop.f32.mrf.mxu0 }
 0x205   :  { %v2783_v60 = vpop.f32.mrf.mxu2 }
 0x206   :  { %v2785_v53 = vpop.f32.mrf.mxu3  ;;  %v1210_v18 = vpop.f32.mrf.mxu1 }
 0x207   :  { %v1191_v20 = vpop.f32.mrf.mxu0 }
 0x208   :  { %v1192_v12 = vadd.f32 %v1191_v20, %v1115_v4 }
 0x20a   :  { %v1211_v28 = vadd.f32 %v1210_v18, %v1192_v12  ;;  %v1417_v18 = vld [vmem:[#allocation11 + $0x18] sm:$0xff]  ;;  %v1416_v12 = vld [vmem:[#allocation11 + $0x10] sm:$0xff] }
 0x20b   :  { %1462 = vmatpush.msrb.mxu0 %v1417_v18  ;;  %1714 = vmatpush.msrb.mxu2 %v1417_v18 }
 0x20c   :  { %v1266_v58 = vsub.f32 %v1211_v28, %v1258_v42  ;;  %v1155_v42 = vadd.f32 %v2765_v19, %v2763_v16  ;;  %v1261_v19 = vmul.f32 %v2810_v11, %v2810_v11 }
 0x20d   :  { %v1229_v7 = vpop.f32.mrf.mxu2  ;;  %1463 = vmatpush.msrb.mxu0 %v1416_v12  ;;  %1715 = vmatpush.msrb.mxu2 %v1416_v12 }
 0x20e   :  { %v1274_v34 = vmax.f32 %v1266_v58, 0.0  ;;  %v1248_v40 = vpop.f32.mrf.mxu3  ;;  %v1230_v5 = vadd.f32 %v1229_v7, %v1153_v55  ;;  %v1212_v36 = vpop.f32.mrf.mxu1  ;;  %v2832_v7 = vadd.f32 %v2747_v44, %v1031_v52 }
 0x20f   :  { %v1193_v62 = vpop.f32.mrf.mxu0  ;;  %1464 = vmatpush.msrb.mxu0 %v1415_v26  ;;  %1716 = vmatpush.msrb.mxu2 %v1415_v26 }
 0x210   :  { %v2800_v30 = vadd.f32 1e-05, %v1274_v34  ;;  %v1194_v4 = vadd.f32 %v1193_v62, %v1117_v6  ;;  %v1249_v20 = vadd.f32 %v1248_v40, %v1230_v5  ;;  %v1433_v6 = vld [vmem:[#allocation11 + $0x98] sm:$0xff]  ;;  %v1432_v62 = vld [vmem:[#allocation11 + $0x90] sm:$0xff] }
 0x211   :  { %1465 = vmatpush.msrb.mxu0 %v1414_v41  ;;  %1491 = vmatpush.msrb.mxu1 %v1433_v6 }
 0x212   :  { %1762 = vrsqrt.f32 %v2800_v30  ;;  %v1213_v15 = vadd.f32 %v1212_v36, %v1194_v4  ;;  %v1267_v14 = vsub.f32 %v1249_v20, %v1259_v8  ;;  %1730 = vmatpush.msrb.mxu3 %v1433_v6  ;;  %1717 = vmatpush.msrb.mxu2 %v1414_v41  ;;  %v1033_v36 = vadd.f32 %v2751_v17, %v2727_v24 }
 0x213   :  { %1492 = vmatpush.msrb.mxu1 %v1432_v62  ;;  %v1282_v4 = vsub.f32 %v2348_v21, %v2781_v23  ;;  %v1283_v20 = vsub.f32 %v2351_v63, %v2792_v45  ;;  %v1263_v24 = vmul.f32 %v2832_v7, %v2832_v7  ;;  %v1158_v17 = vadd.f32 %v2773_v59, %v2771_v1 }
 0x214   :  { %v1268_v39 = vsub.f32 %v1213_v15, %v1260_v50  ;;  %v1275_v28 = vmax.f32 %v1267_v14, 0.0  ;;  %1731 = vmatpush.msrb.mxu3 %v1432_v62  ;;  %v1264_v50 = vmul.f32 %v2749_v33, %v2749_v33  ;;  %v2852_v21 = vadd.f32 %v2753_v43, %v1033_v36  ;;  %v1386_v43 = vld [vmem:[%s2971_s3] sm:$0x3] }
 0x215   :  { %v1231_v55 = vpop.f32.mrf.mxu2  ;;  %1493 = vmatpush.msrb.mxu1 %v1431_v29  ;;  %vm1304_vm1 = vweird.f32 %v2800_v30  ;;  %v1160_v62 = vadd.f32 %v2785_v53, %v2783_v60 }
 0x216   :  { %v1276_v58 = vmax.f32 %v1268_v39, 0.0  ;;  %v1250_v22 = vpop.f32.mrf.mxu3  ;;  %v2821_v9 = vadd.f32 1e-05, %v1275_v28  ;;  %v1232_v2 = vadd.f32 %v1231_v55, %v1155_v42  ;;  %v1215_v5 = vpop.f32.mrf.mxu1  ;;  %1732 = vmatpush.msrb.mxu3 %v1431_v29  ;;  %v1122_v39 = vadd.f32 %v2777_v46, %v2775_v51  ;;  %v1400_v55 = vld [vmem:[#allocation8] sm:$0x3] }
 0x217   :  { %v1196_v13 = vpop.f32.mrf.mxu0  ;;  %1494 = vmatpush.msrb.mxu1 %v1430_v32 }
 0x218   :  { %v2823_v16 = vpop.eup %1762  ;;  %v2827_v34 = vadd.f32 1e-05, %v1276_v58  ;;  %v1197_v31 = vadd.f32 %v1196_v13, %v1120_v38  ;;  %1764 = vrsqrt.f32 %v2821_v9  ;;  %v1251_v37 = vadd.f32 %v1250_v22, %v1232_v2  ;;  %1733 = vmatpush.msrb.mxu3 %v1430_v32 }
 0x219   :  { %v1299_v40 = vmul.f32 %v2823_v16, %v2800_v30  ;;  %vm1305_vm0 = vweird.f32 %v2823_v16  ;;  %v1265_v22 = vmul.f32 %v2852_v21, %v2852_v21  ;;  %v2880_v2 = vperm.slane %v1386_v43, 0 }
 0x21a   :  { %1766 = vrsqrt.f32 %v2827_v34  ;;  %v1216_v61 = vadd.f32 %v1215_v5, %v1197_v31  ;;  %v1269_v8 = vsub.f32 %v1251_v37, %v1261_v19  ;;  %vm1306_vm2 = vmor %vm1304_vm1, %vm1305_vm0  ;;  %v2885_v5 = vperm.slane %v1400_v55, 0 }
 0x21b   :  { %v1300_v44 = vmul.f32 %v2823_v16, %v1299_v40  ;;  %vm1314_vm3 = vweird.f32 %v2821_v9  ;;  %vm1324_vm5 = vweird.f32 %v2827_v34  ;;  %v2897_v32 = vperm.slane %v1386_v43, 1 }
 0x21c   :  { %v1270_v54 = vsub.f32 %v1216_v61, %v1262_v10  ;;  %v1277_v23 = vmax.f32 %v1269_v8, 0.0 }
 0x21d   :  { %v1301_v18 = vmul.f32 0.5, %v1300_v44  ;;  %v1234_v14 = vpop.f32.mrf.mxu2 }
 0x21e   :  { %v1278_v15 = vmax.f32 %v1270_v54, 0.0  ;;  %v1253_v12 = vpop.f32.mrf.mxu3  ;;  %v2854_v56 = vpop.eup %1764  ;;  %v1235_v59 = vadd.f32 %v1234_v14, %v1158_v17  ;;  %v2867_v26 = vadd.f32 1e-05, %v1277_v23 }
 0x21f   :  { %v1302_v1 = vsub.f32 1.5, %v1301_v18  ;;  %v1198_v52 = vpop.f32.mrf.mxu0  ;;  %v1309_v28 = vmul.f32 %v2854_v56, %v2821_v9  ;;  %v1217_v19 = vpop.f32.mrf.mxu1  ;;  %vm1315_vm4 = vweird.f32 %v2854_v56 }
 0x220   :  { %v2862_v42 = vpop.eup %1766  ;;  %v2869_v51 = vadd.f32 1e-05, %v1278_v15  ;;  %v1254_v38 = vadd.f32 %v1253_v12, %v1235_v59  ;;  %v1199_v58 = vadd.f32 %v1198_v52, %v1122_v39  ;;  %1768 = vrsqrt.f32 %v2867_v26  ;;  %vm1316_vm6 = vmor %vm1314_vm3, %vm1315_vm4 }
 0x221   :  { %v1303_v46 = vmul.f32 %v2823_v16, %v1302_v1  ;;  %v1319_v25 = vmul.f32 %v2862_v42, %v2827_v34  ;;  %v1310_v30 = vmul.f32 %v2854_v56, %v1309_v28  ;;  %vm1325_vm7 = vweird.f32 %v2862_v42 }
 0x222   :  { %1770 = vrsqrt.f32 %v2869_v51  ;;  %v1271_v6 = vsub.f32 %v1254_v38, %v1263_v24  ;;  %v1218_v10 = vadd.f32 %v1217_v19, %v1199_v58  ;;  %v2910_v1 = vperm.slane %v1400_v55, 1  ;;  %vm1326_vm8 = vmor %vm1324_vm5, %vm1325_vm7 }
 0x223   :  { %v1307_v13 = vsel %vm1306_vm2, %v2823_v16, %v1303_v46  ;;  %v1320_v41 = vmul.f32 %v2862_v42, %v1319_v25  ;;  %v1311_v31 = vmul.f32 0.5, %v1310_v30  ;;  %v1284_v28 = vsub.f32 %v2412_v47, %v2735_v57 }
 0x224   :  { %v1378_v40 = vmul.f32 %v1307_v13, %v1282_v4  ;;  %v1279_v37 = vmax.f32 %v1271_v6, 0.0  ;;  %v1272_v16 = vsub.f32 %v1218_v10, %v1264_v50  ;;  %v1285_v13 = vsub.f32 %v2452_v48, %v2810_v11 }
 0x225   :  { %v1321_v36 = vmul.f32 0.5, %v1320_v41  ;;  %v1312_v61 = vsub.f32 1.5, %v1311_v31  ;;  %v1236_v44 = vpop.f32.mrf.mxu2  ;;  %vm1334_vm11 = vweird.f32 %v2867_v26  ;;  %vm1344_vm12 = vweird.f32 %v2869_v51 }
 0x226   :  { %v1392_v29 = vmul.f32 %v2880_v2, %v1378_v40  ;;  %v2893_v4 = vadd.f32 1e-05, %v1279_v37  ;;  %v1237_v54 = vadd.f32 %v1236_v44, %v1160_v62  ;;  %v1769_v24 = vpop.eup %1768  ;;  %v1280_v53 = vmax.f32 %v1272_v16, 0.0  ;;  %v1255_v17 = vpop.f32.mrf.mxu3 }
 0x227   :  { %v1322_v8 = vsub.f32 1.5, %v1321_v36  ;;  %v1313_v60 = vmul.f32 %v2854_v56, %v1312_v61  ;;  %v1329_v50 = vmul.f32 %v1769_v24, %v2867_v26  ;;  %vm1335_vm9 = vweird.f32 %v1769_v24 }
 0x228   :  { %v1406_v18 = vadd.f32 %v2885_v5, %v1392_v29  ;;  %v1771_v23 = vpop.eup %1770  ;;  %1772 = vrsqrt.f32 %v2893_v4  ;;  %v1256_v15 = vadd.f32 %v1255_v17, %v1237_v54  ;;  %v2908_v39 = vadd.f32 1e-05, %v1280_v53  ;;  %vm1336_vm13 = vmor %vm1334_vm11, %vm1335_vm9 }
 0x229   :  { %v1317_v14 = vsel %vm1316_vm6, %v2854_v56, %v1313_v60  ;;  %v1339_v12 = vmul.f32 %v1771_v23, %v2869_v51  ;;  %v1330_v59 = vmul.f32 %v1769_v24, %v1329_v50  ;;  %v1323_v43 = vmul.f32 %v2862_v42, %v1322_v8 }
 0x22a   :  { %1466 = vmatmul.f32.vlgmr.msrb.gmra.mxu0 %v1406_v18  ;;  %v1273_v52 = vsub.f32 %v1256_v15, %v1265_v22  ;;  %v1379_v9 = vmul.f32 %v1317_v14, %v1283_v20  ;;  %1774 = vrsqrt.f32 %v2908_v39  ;;  %vm1345_vm10 = vweird.f32 %v1771_v23 }
 0x22b   :  { %v1340_v46 = vmul.f32 %v1771_v23, %v1339_v12  ;;  %v1331_v56 = vmul.f32 0.5, %v1330_v59  ;;  %v1327_v58 = vsel %vm1326_vm8, %v2862_v42, %v1323_v43  ;;  %v1286_v10 = vsub.f32 %v2569_v35, %v2813_v27  ;;  %vm1346_vm14 = vmor %vm1344_vm12, %vm1345_vm10 }
 0x22c   :  { %v1281_v25 = vmax.f32 %v1273_v52, 0.0  ;;  %v1393_v38 = vmul.f32 %v2897_v32, %v1379_v9  ;;  %v1380_v63 = vmul.f32 %v1327_v58, %v1284_v28  ;;  %vm1354_vm0 = vweird.f32 %v2893_v4 }
 0x22d   :  { %v1341_v55 = vmul.f32 0.5, %v1340_v46  ;;  %v1332_v20 = vsub.f32 1.5, %v1331_v56  ;;  %v1287_v54 = vsub.f32 %v2565_v0, %v2832_v7  ;;  %vm1364_vm3 = vweird.f32 %v2908_v39 }
 0x22e   :  { %v1773_v45 = vpop.eup %1772  ;;  %v2923_v22 = vadd.f32 1e-05, %v1281_v25  ;;  %v1407_v47 = vadd.f32 %v2910_v1, %v1393_v38  ;;  %v1394_v30 = vmul.f32 %v2880_v2, %v1380_v63  ;;  %v1289_v52 = vsub.f32 %v2583_v3, %v2852_v21 }
 0x22f   :  { %v1342_v57 = vsub.f32 1.5, %v1341_v55  ;;  %v1349_v34 = vmul.f32 %v1773_v45, %v2893_v4  ;;  %v1333_v42 = vmul.f32 %v1769_v24, %v1332_v20  ;;  %vm1355_vm15 = vweird.f32 %v1773_v45 }
 0x230   :  { %1776 = vrsqrt.f32 %v2923_v22  ;;  %1495 = vmatmul.f32.vlgmr.msrb.gmra.mxu1 %v1407_v47  ;;  %v1775_v41 = vpop.eup %1774  ;;  %v1408_v31 = vadd.f32 %v2885_v5, %v1394_v30  ;;  %vm1356_vm1 = vmor %vm1354_vm0, %vm1355_vm15  ;;  %vm1374_vm6 = vweird.f32 %v2923_v22 }
 0x231   :  { %v1343_v6 = vmul.f32 %v1771_v23, %v1342_v57  ;;  %v1350_v19 = vmul.f32 %v1773_v45, %v1349_v34  ;;  %v1359_v48 = vmul.f32 %v1775_v41, %v2908_v39  ;;  %v1337_v11 = vsel %vm1336_vm13, %v1769_v24, %v1333_v42 }
 0x232   :  { %1469 = vmatmul.f32.gmra.mxu0 %v1408_v31  ;;  %v1381_v62 = vmul.f32 %v1337_v11, %v1285_v13  ;;  %vm1365_vm2 = vweird.f32 %v1775_v41 }
 0x233   :  { %v1347_v26 = vsel %vm1346_vm14, %v1771_v23, %v1343_v6  ;;  %v1351_v40 = vmul.f32 0.5, %v1350_v19  ;;  %v1360_v36 = vmul.f32 %v1775_v41, %v1359_v48  ;;  %v1288_v23 = vsub.f32 %v2581_v49, %v2749_v33  ;;  %vm1366_vm4 = vmor %vm1364_vm3, %vm1365_vm2 }
 0x234   :  { %v1382_v37 = vmul.f32 %v1347_v26, %v1286_v10  ;;  %v1395_v61 = vmul.f32 %v2897_v32, %v1381_v62 }
 0x235   :  { %v1352_v51 = vsub.f32 1.5, %v1351_v40  ;;  %v1361_v44 = vmul.f32 0.5, %v1360_v36 }
 0x236   :  { %v1777_v16 = vpop.eup %1776  ;;  %v1396_v29 = vmul.f32 %v2880_v2, %v1382_v37  ;;  %v1409_v8 = vadd.f32 %v2910_v1, %v1395_v61 }
 0x237   :  { %v1353_v35 = vmul.f32 %v1773_v45, %v1352_v51  ;;  %v1369_v27 = vmul.f32 %v1777_v16, %v2923_v22  ;;  %v1362_v24 = vsub.f32 1.5, %v1361_v44  ;;  %vm1375_vm5 = vweird.f32 %v1777_v16 }
 0x238   :  { %v1410_v60 = vadd.f32 %v2885_v5, %v1396_v29  ;;  %1498 = vmatmul.f32.gmra.mxu1 %v1409_v8  ;;  %vm1376_vm7 = vmor %vm1374_vm6, %vm1375_vm5 }
 0x239   :  { %v1357_v53 = vsel %vm1356_vm1, %v1773_v45, %v1353_v35  ;;  %v1370_v17 = vmul.f32 %v1777_v16, %v1369_v27  ;;  %v1363_v4 = vmul.f32 %v1775_v41, %v1362_v24 }
 0x23a   :  { %1472 = vmatmul.f32.vlgmr.msrb.gmra.mxu2 %v1410_v60  ;;  %v1383_v18 = vmul.f32 %v1357_v53, %v1287_v54 }
 0x23b   :  { %v1371_v50 = vmul.f32 0.5, %v1370_v17  ;;  %v1367_v7 = vsel %vm1366_vm4, %v1775_v41, %v1363_v4 }
 0x23c   :  { %v1397_v0 = vmul.f32 %v2897_v32, %v1383_v18  ;;  %v1384_v14 = vmul.f32 %v1367_v7, %v1288_v23 }
 0x23d   :  { %v1372_v15 = vsub.f32 1.5, %v1371_v50 }
 0x23e   :  { %v1411_v12 = vadd.f32 %v2910_v1, %v1397_v0  ;;  %v1398_v39 = vmul.f32 %v2880_v2, %v1384_v14  ;;  %v1745_v2 = vld [vmem:[%s2975_s7] ss:$0 sm:$0xff] }
 0x23f   :  { %v1373_v59 = vmul.f32 %v1777_v16, %v1372_v15 }
 0x240   :  { %1501 = vmatmul.f32.vlgmr.msrb.gmra.mxu3 %v1411_v12  ;;  %v1412_v49 = vadd.f32 %v2885_v5, %v1398_v39 }
 0x241   :  { %v1377_v33 = vsel %vm1376_vm7, %v1777_v16, %v1373_v59 }
 0x242   :  { %v1385_v9 = vmul.f32 %v1377_v33, %v1289_v52  ;;  %1475 = vmatmul.f32.gmra.mxu2 %v1412_v49 }
 0x244   :  { %v1399_v43 = vmul.f32 %v2897_v32, %v1385_v9 }
 0x246   :  { %v1413_v28 = vadd.f32 %v2910_v1, %v1399_v43 }
 0x248   :  { %1504 = vmatmul.f32.gmra.mxu3 %v1413_v28 }
 0x2a7   :  { %v1467_v46 = vpop.f32.mrf.mxu0 }
 0x2a8   :  { %v1468_v56 = vadd.f32 %v1745_v2, %v1467_v46 }
 0x2ad   :  { %v1496_v25 = vpop.f32.mrf.mxu1 }
 0x2ae   :  { %v1497_v3 = vadd.f32 %v1496_v25, %v1468_v56 }
 0x2af   :  { %v1470_v21 = vpop.f32.mrf.mxu0 }
 0x2b0   :  { %1508 = vst [vmem:[#allocation13] sm:$0xff] %v1497_v3  ;;  %v1471_v38 = vadd.f32 %v1745_v2, %v1470_v21 }
 0x2b5   :  { %v1499_v5 = vpop.f32.mrf.mxu1 }
 0x2b6   :  { %v1500_v58 = vadd.f32 %v1499_v5, %v1471_v38 }
 0x2b8   :  { %1509 = vst [vmem:[#allocation13 + $0x8] sm:$0xff] %v1500_v58 }
 0x2bd   :  { %v1473_v55 = vpop.f32.mrf.mxu2 }
 0x2be   :  { %v1474_v63 = vadd.f32 %v1745_v2, %v1473_v55 }
 0x2c3   :  { %v1502_v32 = vpop.f32.mrf.mxu3 }
 0x2c4   :  { %v1503_v45 = vadd.f32 %v1502_v32, %v1474_v63 }
 0x2c5   :  { %v1476_v1 = vpop.f32.mrf.mxu2 }
 0x2c6   :  { %1510 = vst [vmem:[#allocation13 + $0x10] sm:$0xff] %v1503_v45  ;;  %v1477_v20 = vadd.f32 %v1745_v2, %v1476_v1 }
 0x2cb   :  { %v1505_v22 = vpop.f32.mrf.mxu3 }
 0x2cc   :  { %v1506_v47 = vadd.f32 %v1505_v22, %v1477_v20 }
 0x2ce   :  { %1511 = vst [vmem:[#allocation13 + $0x18] sm:$0xff] %v1506_v47 }
 0x2cf   :  { %1524 = dma.vmem_to_hbm [thread:$0]  %s1517_s15, 512, %s1519_s17, [#allocation4], %s1963_s9, %s1963_s9, %s1964_s10  }
 0x2d0   :  { %1954 = dma.done.wait [#allocation4], 512  }
 0x2d1   :  { %1955 = vsyncadd [#allocation4], 4294966784 }
 0x2d2   :  { %1529 = vsyncpa [#allocation3], 1 }
 0x2d3   :  { %1530 = vsyncpa [#allocation6], 1 }
 0x2d4   :  { %1531 = vsyncpa [#allocation9], 1 }
 0x2d5   :  { %1532 = vsyncpa [#allocation12], 1 }
 0x2d6   :  { %1533 = vsyncpa [#allocation4], 1 }

</bundles_post_ra>
